<compile_context>
chip_gen: v5e
topology: v5e:2x2
jax: 0.10.0
libtpu: 0.0.40
codegen_flags: <defaults>
</compile_context>

<pallas_src>
import functools

import jax
import jax.numpy as jnp
from jax.experimental import pallas as pl
from jax.experimental.pallas import tpu as pltpu


def _round_up(x, m):
    return (x + m - 1) // m * m


def _pad_deinterleave(src_ref, xe_s, xo_s, *, relu):
    """Zero-pad (1 px) + stride-2 column de-interleave of `src_ref` into VMEM.

    xe_s[r, j, :] = src_pad[r, 2*j,   :]   (even padded columns)
    xo_s[r, j, :] = src_pad[r, 2*j+1, :]   (odd  padded columns)

    Only the halo (rows 0 and H+1, even-plane column 0, trailing never-written
    columns) is zero-filled each step; the interior is fully overwritten, so no
    full-plane memset is needed and correctness holds for any grid sharding.
    """
    H, W, _ = src_ref.shape
    cdt = xe_s.dtype
    He, We, C = xe_s.shape            # He == H + 2, We == Wo + 1
    _, Wo_o, _ = xo_s.shape           # Wo_o == Wo
    n_odd, n_even = W // 2, (W + 1) // 2

    # --- halo-only zeroing -------------------------------------------------
    for r in (0, H + 1):                                       # top/bottom rows
        xe_s[pl.ds(r, 1), :, :] = jnp.zeros((1, We, C), cdt)
        xo_s[pl.ds(r, 1), :, :] = jnp.zeros((1, Wo_o, C), cdt)
    xe_s[:, pl.ds(0, 1), :] = jnp.zeros((He, 1, C), cdt)        # left pad column
    te = We - (n_odd + 1)                                       # trailing (odd W)
    if te > 0:
        xe_s[:, pl.ds(n_odd + 1, te), :] = jnp.zeros((He, te, C), cdt)
    to = Wo_o - n_even
    if to > 0:
        xo_s[:, pl.ds(n_even, to), :] = jnp.zeros((He, to, C), cdt)

    # --- interior: one strided de-interleave pass (cast + optional relu) ----
    def read(col0, n):
        v = src_ref[pl.ds(0, H), pl.ds(col0, n, stride=2), :]
        if relu:
            v = jnp.maximum(v, 0.0)
        return v.astype(cdt)

    if n_odd > 0:
        xe_s[pl.ds(1, H), pl.ds(1, n_odd), :] = read(1, n_odd)   # odd src cols
    xo_s[pl.ds(1, H), pl.ds(0, n_even), :] = read(0, n_even)     # even src cols


def _conv3x3_s2_im2col(xe, xo, patch_s, w_ref, b_ref, out_ref):
    """3x3 / stride-2 conv over padded, column-de-interleaved planes.

    Folds all 9 taps into ONE K = 9*Cin MXU matmul (im2col).  patch_s has its
    Wo dim padded to a multiple of 8 so the flatten/unflatten reshapes around
    the matmul are layout no-ops; padded rows are discarded after the dot.
    """
    Ho, Wo_pad, K9 = patch_s.shape
    Cin = K9 // 9
    _, Wo, Cout = out_ref.shape

    # Keep the never-used padded tail defined (its results are sliced away).
    if Wo_pad > Wo:
        patch_s[:, pl.ds(Wo, Wo_pad - Wo), :] = jnp.zeros(
            (Ho, Wo_pad - Wo, K9), patch_s.dtype)

    for ky in range(3):
        # Output row i reads padded row 2*i + ky (stride-2 only on the leading,
        # non-tiled axis); columns are contiguous within each plane.
        rows = pl.ds(ky, Ho, stride=2)
        cols = pl.ds(0, Wo)
        patch_s[:, cols, pl.ds((3 * ky + 0) * Cin, Cin)] = xe[rows, pl.ds(0, Wo), :]
        patch_s[:, cols, pl.ds((3 * ky + 1) * Cin, Cin)] = xo[rows, pl.ds(0, Wo), :]
        patch_s[:, cols, pl.ds((3 * ky + 2) * Cin, Cin)] = xe[rows, pl.ds(1, Wo), :]

    # Wo_pad % 8 == 0 -> both reshapes are free (no (8,128)-tile repack).
    acc = jnp.dot(
        patch_s[...].reshape(Ho * Wo_pad, K9),
        w_ref[...],
        preferred_element_type=jnp.float32,
    ).reshape(Ho, Wo_pad, Cout)
    out = acc[:, :Wo, :] + b_ref[...].astype(jnp.float32)
    out_ref[...] = out.astype(out_ref.dtype)


def _p6p7_kernel(x_ref, w6_ref, b6_ref, w7_ref, b7_ref,        # inputs
                 p6_ref, p7_ref,                               # outputs
                 xe_s, xo_s, pat1_s, p6e_s, p6o_s, pat2_s):    # VMEM scratch
    """One batch element (NHWC): p6 = conv(x); p7 = conv(relu(p6)), all in VMEM."""
    # stage 0: in-kernel zero pad + column de-interleave of x
    _pad_deinterleave(x_ref, xe_s, xo_s, relu=False)
    # stage 1: p6 = conv3x3/s2(x) + b6  (single K = 9*Cin matmul)
    _conv3x3_s2_im2col(xe_s, xo_s, pat1_s, w6_ref, b6_ref, p6_ref)
    # stage 2: pad + de-interleave relu(p6) entirely in VMEM (relu applied once)
    _pad_deinterleave(p6_ref, p6e_s, p6o_s, relu=True)
    # stage 3: p7 = conv3x3/s2(relu(p6)) + b7
    _conv3x3_s2_im2col(p6e_s, p6o_s, pat2_s, w7_ref, b7_ref, p7_ref)


def _vmem_budget_bytes(H, W, Cin, Cout, Ho6, Wo6, Ho7, Wo7, Wo6_pad, Wo7_pad,
                       x_dtype, compute_dtype, out_dtype):
    bc = jnp.dtype(compute_dtype).itemsize
    bx = jnp.dtype(x_dtype).itemsize
    bo = jnp.dtype(out_dtype).itemsize
    scratch = ((H + 2) * (2 * Wo6 + 1) * Cin * bc
               + Ho6 * Wo6_pad * 9 * Cin * bc
               + (Ho6 + 2) * (2 * Wo7 + 1) * Cout * bc
               + Ho7 * Wo7_pad * 9 * Cout * bc)
    blocks = 2 * (H * W * Cin * bx                       # x block (dbl-buffered)
                  + Ho6 * Wo6 * Cout * bo                # p6 block
                  + Ho7 * Wo7 * Cout * bo                # p7 block
                  + 9 * (Cin + Cout) * Cout * bc         # weights
                  + 2 * Cout * 4)                        # biases
    return scratch + blocks


def p6p7_forward(x_nhwc, w6, b6, w7, b7, *,
                 compute_dtype=jnp.bfloat16, out_dtype=None):
    """Fused p6/p7 forward. x_nhwc: (N,H,W,Cin); w: HWIO (3,3,Ci,Co)."""
    N, H, W, Cin = x_nhwc.shape
    Cout = w6.shape[-1]
    if out_dtype is None:
        out_dtype = x_nhwc.dtype

    Ho6, Wo6 = (H + 1) // 2, (W + 1) // 2
    Ho7, Wo7 = (Ho6 + 1) // 2, (Wo6 + 1) // 2
    Wo6_pad, Wo7_pad = _round_up(Wo6, 8), _round_up(Wo7, 8)

    # NOTE: x is passed in its original dtype; the kernel casts during the
    # de-interleave copy (no standalone HBM cast pass on the NHWC path).
    # Fold (ky, kx, ci) into a single K = 9*Cin axis matching the patch layout.
    w6f = w6.astype(compute_dtype).reshape(9 * Cin, Cout)
    w7f = w7.astype(compute_dtype).reshape(9 * Cout, Cout)
    b6f = b6.reshape(1, Cout).astype(jnp.float32)
    b7f = b7.reshape(1, Cout).astype(jnp.float32)

    budget = _vmem_budget_bytes(H, W, Cin, Cout, Ho6, Wo6, Ho7, Wo7,
                                Wo6_pad, Wo7_pad, x_nhwc.dtype,
                                compute_dtype, out_dtype)
    # Explicit scoped-VMEM budget (default: 16 MiB on v5e, 32 MiB on v6e/v7x);
    # cap at v7x's 64 MiB physical.  Large-channel variants must be Ho-tiled
    # (see TODO at top) before they can exceed this.
    vmem_limit = int(min(64 * 2**20, max(32 * 2**20, budget * 3 // 2 + (2 << 20))))

    p6, p7 = pl.pallas_call(
        _p6p7_kernel,
        out_shape=(
            jax.ShapeDtypeStruct((N, Ho6, Wo6, Cout), out_dtype),
            jax.ShapeDtypeStruct((N, Ho7, Wo7, Cout), out_dtype),
        ),
        grid_spec=pltpu.PrefetchScalarGridSpec(
            num_scalar_prefetch=0,
            grid=(N,),
            in_specs=[
                pl.BlockSpec((None, H, W, Cin), lambda n: (n, 0, 0, 0)),
                pl.BlockSpec((9 * Cin, Cout), lambda n: (0, 0)),
                pl.BlockSpec((1, Cout), lambda n: (0, 0)),
                pl.BlockSpec((9 * Cout, Cout), lambda n: (0, 0)),
                pl.BlockSpec((1, Cout), lambda n: (0, 0)),
            ],
            out_specs=[
                pl.BlockSpec((None, Ho6, Wo6, Cout), lambda n: (n, 0, 0, 0)),
                pl.BlockSpec((None, Ho7, Wo7, Cout), lambda n: (n, 0, 0, 0)),
            ],
            scratch_shapes=[
                pltpu.VMEM((H + 2, Wo6 + 1, Cin), compute_dtype),      # xe_s
                pltpu.VMEM((H + 2, Wo6, Cin), compute_dtype),          # xo_s
                pltpu.VMEM((Ho6, Wo6_pad, 9 * Cin), compute_dtype),    # pat1_s
                pltpu.VMEM((Ho6 + 2, Wo7 + 1, Cout), compute_dtype),   # p6e_s
                pltpu.VMEM((Ho6 + 2, Wo7, Cout), compute_dtype),       # p6o_s
                pltpu.VMEM((Ho7, Wo7_pad, 9 * Cout), compute_dtype),   # pat2_s
            ],
        ),
        compiler_params=pltpu.CompilerParams(
            dimension_semantics=("parallel",),
            vmem_limit_bytes=vmem_limit,
        ),
    )(x_nhwc, w6f, b6f, w7f, b7f)
    return p6, p7


@functools.partial(jax.jit, static_argnames=("compute_dtype", "out_dtype"))
def _forward_nhwc(x_nhwc, w6, b6, w7, b7, *, compute_dtype, out_dtype):
    return p6p7_forward(x_nhwc, w6, b6, w7, b7,
                        compute_dtype=compute_dtype, out_dtype=out_dtype)


@functools.partial(jax.jit, static_argnames=("compute_dtype",))
def _forward_nchw(c5_nchw, w6, b6, w7, b7, *, compute_dtype):
    # NCHW -> NHWC; the compute-dtype cast fuses with this transpose pass.
    x = jnp.transpose(c5_nchw, (0, 2, 3, 1)).astype(compute_dtype)
    p6, p7 = p6p7_forward(x, w6, b6, w7, b7,
                          compute_dtype=compute_dtype, out_dtype=c5_nchw.dtype)
    # Prefer forward_nhwc in an NHWC pipeline: drops these HBM transpose passes
    # (the single largest end-to-end lever) and allows bf16 outputs.
    return jnp.transpose(p6, (0, 3, 1, 2)), jnp.transpose(p7, (0, 3, 1, 2))


class LastLevelP6P7_P5:
    """JAX/Pallas port of the PyTorch module. Deterministic c2_xavier init."""

    def __init__(self, in_channels, out_channels, key, compute_dtype=jnp.bfloat16):
        self.num_levels = 2
        self.in_feature = "p5"
        self.compute_dtype = compute_dtype
        k6, k7 = jax.random.split(key)

        def c2_xavier(k, cin, cout):
            # c2_xavier_fill: kaiming_uniform(a=1) -> U(+-sqrt(3/fan_in)), bias 0.
            fan_in = cin * 3 * 3
            bound = (3.0 / fan_in) ** 0.5
            w = jax.random.uniform(k, (3, 3, cin, cout), jnp.float32, -bound, bound)
            return w, jnp.zeros((cout,), jnp.float32)

        self.w6, self.b6 = c2_xavier(k6, in_channels, out_channels)
        self.w7, self.b7 = c2_xavier(k7, out_channels, out_channels)

    def forward_nhwc(self, x_nhwc, out_dtype=None):
        """NHWC-in / NHWC-out path (no transposes; bf16 outputs supported)."""
        out_dtype = x_nhwc.dtype if out_dtype is None else out_dtype
        return _forward_nhwc(x_nhwc, self.w6, self.b6, self.w7, self.b7,
                             compute_dtype=self.compute_dtype, out_dtype=out_dtype)

    def __call__(self, c5_nchw):
        p6, p7 = _forward_nchw(c5_nchw, self.w6, self.b6, self.w7, self.b7,
                               compute_dtype=self.compute_dtype)
        return [p6, p7]


def _reference_forward(c5_nchw, w6, b6, w7, b7):
    """Pure-JAX reference (XLA conv) for correctness checking."""
    dn = ("NCHW", "HWIO", "NCHW")
    p6 = jax.lax.conv_general_dilated(
        c5_nchw, w6, (2, 2), ((1, 1), (1, 1)), dimension_numbers=dn
    ) + b6.reshape(1, -1, 1, 1)
    p7 = jax.lax.conv_general_dilated(
        jax.nn.relu(p6), w7, (2, 2), ((1, 1), (1, 1)), dimension_numbers=dn
    ) + b7.reshape(1, -1, 1, 1)
    return p6, p7


if __name__ == "__main__":
    key = jax.random.PRNGKey(0)
    k_param, k_in = jax.random.split(key)

    N, Cin, Cout, H, W = 2, 4, 8, 16, 16
    c5 = jax.random.normal(k_in, (N, Cin, H, W), jnp.float32)  # NCHW, like PyTorch
    Ho6, Wo6 = (H + 1) // 2, (W + 1) // 2
    Ho7, Wo7 = (Ho6 + 1) // 2, (Wo6 + 1) // 2

    # --- f32 compute path: tight check against the XLA reference conv ---
    module = LastLevelP6P7_P5(Cin, Cout, k_param, compute_dtype=jnp.float32)
    p6, p7 = module(c5)
    jax.block_until_ready(p6)
    jax.block_until_ready(p7)

    p6_ref, p7_ref = _reference_forward(c5, module.w6, module.b6,
                                        module.w7, module.b7)
    assert p6.shape == (N, Cout, Ho6, Wo6) and p7.shape == (N, Cout, Ho7, Wo7)
    assert jnp.allclose(p6, p6_ref, atol=1e-4, rtol=1e-4)
    assert jnp.allclose(p7, p7_ref, atol=1e-4, rtol=1e-4)

    # --- bf16 MXU path (perf configuration), NCHW wrapper: loose check ---
    module_bf16 = LastLevelP6P7_P5(Cin, Cout, k_param, compute_dtype=jnp.bfloat16)
    q6, q7 = module_bf16(c5)
    jax.block_until_ready(q7)
    err6 = jnp.max(jnp.abs(q6 - p6_ref))
    err7 = jnp.max(jnp.abs(q7 - p7_ref))
    assert err6 < 0.1 * jnp.max(jnp.abs(p6_ref)) + 0.05
    assert err7 < 0.1 * jnp.max(jnp.abs(p7_ref)) + 0.05

    # --- NHWC end-to-end path (no transposes, bf16 outputs): loose check ---
    x_nhwc = jnp.transpose(c5, (0, 2, 3, 1))
    r6, r7 = module_bf16.forward_nhwc(x_nhwc, out_dtype=jnp.bfloat16)
    jax.block_until_ready(r7)
    assert r6.shape == (N, Ho6, Wo6, Cout) and r7.shape == (N, Ho7, Wo7, Cout)
    err_nhwc = jnp.max(jnp.abs(r7.astype(jnp.float32)
                               - jnp.transpose(p7_ref, (0, 2, 3, 1))))
    assert err_nhwc < 0.1 * jnp.max(jnp.abs(p7_ref)) + 0.05

    print("KERNEL_OK")
</pallas_src>

<mosaic_0001>
module attributes {stable_mosaic.version = 11 : i64} {
  func.func @_p6p7_kernel(%arg0: i32, %arg1: memref<1x16x16x4xf32, #tpu.memory_space<vmem>>, %arg2: memref<36x8xf32, #tpu.memory_space<vmem>>, %arg3: memref<1x8xf32, #tpu.memory_space<vmem>>, %arg4: memref<72x8xf32, #tpu.memory_space<vmem>>, %arg5: memref<1x8xf32, #tpu.memory_space<vmem>>, %arg6: memref<1x8x8x8xf32, #tpu.memory_space<vmem>>, %arg7: memref<1x4x4x8xf32, #tpu.memory_space<vmem>>, %arg8: memref<18x9x4xf32, #tpu.memory_space<vmem>>, %arg9: memref<18x8x4xf32, #tpu.memory_space<vmem>>, %arg10: memref<8x8x36xf32, #tpu.memory_space<vmem>>, %arg11: memref<10x5x8xf32, #tpu.memory_space<vmem>>, %arg12: memref<10x4x8xf32, #tpu.memory_space<vmem>>, %arg13: memref<4x8x72xf32, #tpu.memory_space<vmem>>) attributes {dimension_semantics = [#tpu.dimension_semantics<parallel>], iteration_bounds = array<i64: 2>, scalar_prefetch = 0 : i64, scratch_operands = 6 : i64, tpu.core_type = #tpu.core_type<tc>, window_params = [{transform_indices = @transform_0, window_bounds = array<i64: 1, 16, 16, 4>}, {pipeline_mode = #tpu.pipeline_mode<synchronous>, transform_indices = @transform_1, window_bounds = array<i64: 36, 8>}, {pipeline_mode = #tpu.pipeline_mode<synchronous>, transform_indices = @transform_2, window_bounds = array<i64: 1, 8>}, {pipeline_mode = #tpu.pipeline_mode<synchronous>, transform_indices = @transform_3, window_bounds = array<i64: 72, 8>}, {pipeline_mode = #tpu.pipeline_mode<synchronous>, transform_indices = @transform_4, window_bounds = array<i64: 1, 8>}, {transform_indices = @transform_5, window_bounds = array<i64: 1, 8, 8, 8>}, {transform_indices = @transform_6, window_bounds = array<i64: 1, 4, 4, 8>}]} {
    %cst = arith.constant 0.000000e+00 : f32
    %0 = vector.broadcast %cst : f32 to vector<1x9x4xf32>
    %c0 = arith.constant 0 : index
    %c0_0 = arith.constant 0 : index
    %c0_1 = arith.constant 0 : index
    %1 = vector.load %arg8[%c0, %c0_0, %c0_1] : memref<18x9x4xf32, #tpu.memory_space<vmem>>, vector<1x9x4xf32>
    tpu.vector_store %arg8[%c0, %c0_0, %c0_1], %0 {strides = array<i32>} : memref<18x9x4xf32, #tpu.memory_space<vmem>>, vector<1x9x4xf32>,
    %cst_2 = arith.constant 0.000000e+00 : f32
    %2 = vector.broadcast %cst_2 : f32 to vector<1x8x4xf32>
    %c0_3 = arith.constant 0 : index
    %c0_4 = arith.constant 0 : index
    %c0_5 = arith.constant 0 : index
    %3 = vector.load %arg9[%c0_3, %c0_4, %c0_5] : memref<18x8x4xf32, #tpu.memory_space<vmem>>, vector<1x8x4xf32>
    tpu.vector_store %arg9[%c0_3, %c0_4, %c0_5], %2 {strides = array<i32>} : memref<18x8x4xf32, #tpu.memory_space<vmem>>, vector<1x8x4xf32>,
    %cst_6 = arith.constant 0.000000e+00 : f32
    %4 = vector.broadcast %cst_6 : f32 to vector<1x9x4xf32>
    %c17 = arith.constant 17 : index
    %c0_7 = arith.constant 0 : index
    %c0_8 = arith.constant 0 : index
    %5 = vector.load %arg8[%c17, %c0_7, %c0_8] : memref<18x9x4xf32, #tpu.memory_space<vmem>>, vector<1x9x4xf32>
    tpu.vector_store %arg8[%c17, %c0_7, %c0_8], %4 {strides = array<i32>} : memref<18x9x4xf32, #tpu.memory_space<vmem>>, vector<1x9x4xf32>,
    %cst_9 = arith.constant 0.000000e+00 : f32
    %6 = vector.broadcast %cst_9 : f32 to vector<1x8x4xf32>
    %c17_10 = arith.constant 17 : index
    %c0_11 = arith.constant 0 : index
    %c0_12 = arith.constant 0 : index
    %7 = vector.load %arg9[%c17_10, %c0_11, %c0_12] : memref<18x8x4xf32, #tpu.memory_space<vmem>>, vector<1x8x4xf32>
    tpu.vector_store %arg9[%c17_10, %c0_11, %c0_12], %6 {strides = array<i32>} : memref<18x8x4xf32, #tpu.memory_space<vmem>>, vector<1x8x4xf32>,
    %cst_13 = arith.constant 0.000000e+00 : f32
    %8 = vector.broadcast %cst_13 : f32 to vector<18x1x4xf32>
    %c0_14 = arith.constant 0 : index
    %c0_15 = arith.constant 0 : index
    %c0_16 = arith.constant 0 : index
    %9 = vector.load %arg8[%c0_14, %c0_15, %c0_16] : memref<18x9x4xf32, #tpu.memory_space<vmem>>, vector<18x1x4xf32>
    tpu.vector_store %arg8[%c0_14, %c0_15, %c0_16], %8 {strides = array<i32>} : memref<18x9x4xf32, #tpu.memory_space<vmem>>, vector<18x1x4xf32>,
    %c0_17 = arith.constant 0 : index
    %c0_18 = arith.constant 0 : index
    %c1 = arith.constant 1 : index
    %c0_19 = arith.constant 0 : index
    %10 = tpu.strided_load %arg1[%c0_17, %c0_18, %c1, %c0_19] {strides = array<i32: 1, 1, 2, 1>} : memref<1x16x16x4xf32, #tpu.memory_space<vmem>>, vector<1x16x8x4xf32>
    %11 = vector.shape_cast %10 : vector<1x16x8x4xf32> to vector<16x8x4xf32>
    %c1_20 = arith.constant 1 : index
    %c1_21 = arith.constant 1 : index
    %c0_22 = arith.constant 0 : index
    %12 = vector.load %arg8[%c1_20, %c1_21, %c0_22] : memref<18x9x4xf32, #tpu.memory_space<vmem>>, vector<16x8x4xf32>
    tpu.vector_store %arg8[%c1_20, %c1_21, %c0_22], %11 {strides = array<i32>} : memref<18x9x4xf32, #tpu.memory_space<vmem>>, vector<16x8x4xf32>,
    %c0_23 = arith.constant 0 : index
    %c0_24 = arith.constant 0 : index
    %c0_25 = arith.constant 0 : index
    %c0_26 = arith.constant 0 : index
    %13 = tpu.strided_load %arg1[%c0_23, %c0_24, %c0_25, %c0_26] {strides = array<i32: 1, 1, 2, 1>} : memref<1x16x16x4xf32, #tpu.memory_space<vmem>>, vector<1x16x8x4xf32>
    %14 = vector.shape_cast %13 : vector<1x16x8x4xf32> to vector<16x8x4xf32>
    %c1_27 = arith.constant 1 : index
    %c0_28 = arith.constant 0 : index
    %c0_29 = arith.constant 0 : index
    %15 = vector.load %arg9[%c1_27, %c0_28, %c0_29] : memref<18x8x4xf32, #tpu.memory_space<vmem>>, vector<16x8x4xf32>
    tpu.vector_store %arg9[%c1_27, %c0_28, %c0_29], %14 {strides = array<i32>} : memref<18x8x4xf32, #tpu.memory_space<vmem>>, vector<16x8x4xf32>,
    %c0_30 = arith.constant 0 : index
    %c0_31 = arith.constant 0 : index
    %c0_32 = arith.constant 0 : index
    %16 = tpu.strided_load %arg8[%c0_30, %c0_31, %c0_32] {strides = array<i32: 2, 1, 1>} : memref<18x9x4xf32, #tpu.memory_space<vmem>>, vector<8x8x4xf32>
    %c0_33 = arith.constant 0 : index
    %c0_34 = arith.constant 0 : index
    %c0_35 = arith.constant 0 : index
    %17 = vector.load %arg10[%c0_33, %c0_34, %c0_35] : memref<8x8x36xf32, #tpu.memory_space<vmem>>, vector<8x8x4xf32>
    tpu.vector_store %arg10[%c0_33, %c0_34, %c0_35], %16 {strides = array<i32>} : memref<8x8x36xf32, #tpu.memory_space<vmem>>, vector<8x8x4xf32>,
    %c0_36 = arith.constant 0 : index
    %c0_37 = arith.constant 0 : index
    %c0_38 = arith.constant 0 : index
    %18 = tpu.strided_load %arg9[%c0_36, %c0_37, %c0_38] {strides = array<i32: 2, 1, 1>} : memref<18x8x4xf32, #tpu.memory_space<vmem>>, vector<8x8x4xf32>
    %c0_39 = arith.constant 0 : index
    %c0_40 = arith.constant 0 : index
    %c4 = arith.constant 4 : index
    %19 = vector.load %arg10[%c0_39, %c0_40, %c4] : memref<8x8x36xf32, #tpu.memory_space<vmem>>, vector<8x8x4xf32>
    tpu.vector_store %arg10[%c0_39, %c0_40, %c4], %18 {strides = array<i32>} : memref<8x8x36xf32, #tpu.memory_space<vmem>>, vector<8x8x4xf32>,
    %c0_41 = arith.constant 0 : index
    %c1_42 = arith.constant 1 : index
    %c0_43 = arith.constant 0 : index
    %20 = tpu.strided_load %arg8[%c0_41, %c1_42, %c0_43] {strides = array<i32: 2, 1, 1>} : memref<18x9x4xf32, #tpu.memory_space<vmem>>, vector<8x8x4xf32>
    %c0_44 = arith.constant 0 : index
    %c0_45 = arith.constant 0 : index
    %c8 = arith.constant 8 : index
    %21 = vector.load %arg10[%c0_44, %c0_45, %c8] : memref<8x8x36xf32, #tpu.memory_space<vmem>>, vector<8x8x4xf32>
    tpu.vector_store %arg10[%c0_44, %c0_45, %c8], %20 {strides = array<i32>} : memref<8x8x36xf32, #tpu.memory_space<vmem>>, vector<8x8x4xf32>,
    %c1_46 = arith.constant 1 : index
    %c0_47 = arith.constant 0 : index
    %c0_48 = arith.constant 0 : index
    %22 = tpu.strided_load %arg8[%c1_46, %c0_47, %c0_48] {strides = array<i32: 2, 1, 1>} : memref<18x9x4xf32, #tpu.memory_space<vmem>>, vector<8x8x4xf32>
    %c0_49 = arith.constant 0 : index
    %c0_50 = arith.constant 0 : index
    %c12 = arith.constant 12 : index
    %23 = vector.load %arg10[%c0_49, %c0_50, %c12] : memref<8x8x36xf32, #tpu.memory_space<vmem>>, vector<8x8x4xf32>
    tpu.vector_store %arg10[%c0_49, %c0_50, %c12], %22 {strides = array<i32>} : memref<8x8x36xf32, #tpu.memory_space<vmem>>, vector<8x8x4xf32>,
    %c1_51 = arith.constant 1 : index
    %c0_52 = arith.constant 0 : index
    %c0_53 = arith.constant 0 : index
    %24 = tpu.strided_load %arg9[%c1_51, %c0_52, %c0_53] {strides = array<i32: 2, 1, 1>} : memref<18x8x4xf32, #tpu.memory_space<vmem>>, vector<8x8x4xf32>
    %c0_54 = arith.constant 0 : index
    %c0_55 = arith.constant 0 : index
    %c16 = arith.constant 16 : index
    %25 = vector.load %arg10[%c0_54, %c0_55, %c16] : memref<8x8x36xf32, #tpu.memory_space<vmem>>, vector<8x8x4xf32>
    tpu.vector_store %arg10[%c0_54, %c0_55, %c16], %24 {strides = array<i32>} : memref<8x8x36xf32, #tpu.memory_space<vmem>>, vector<8x8x4xf32>,
    %c1_56 = arith.constant 1 : index
    %c1_57 = arith.constant 1 : index
    %c0_58 = arith.constant 0 : index
    %26 = tpu.strided_load %arg8[%c1_56, %c1_57, %c0_58] {strides = array<i32: 2, 1, 1>} : memref<18x9x4xf32, #tpu.memory_space<vmem>>, vector<8x8x4xf32>
    %c0_59 = arith.constant 0 : index
    %c0_60 = arith.constant 0 : index
    %c20 = arith.constant 20 : index
    %27 = vector.load %arg10[%c0_59, %c0_60, %c20] : memref<8x8x36xf32, #tpu.memory_space<vmem>>, vector<8x8x4xf32>
    tpu.vector_store %arg10[%c0_59, %c0_60, %c20], %26 {strides = array<i32>} : memref<8x8x36xf32, #tpu.memory_space<vmem>>, vector<8x8x4xf32>,
    %c2 = arith.constant 2 : index
    %c0_61 = arith.constant 0 : index
    %c0_62 = arith.constant 0 : index
    %28 = tpu.strided_load %arg8[%c2, %c0_61, %c0_62] {strides = array<i32: 2, 1, 1>} : memref<18x9x4xf32, #tpu.memory_space<vmem>>, vector<8x8x4xf32>
    %c0_63 = arith.constant 0 : index
    %c0_64 = arith.constant 0 : index
    %c24 = arith.constant 24 : index
    %29 = vector.load %arg10[%c0_63, %c0_64, %c24] : memref<8x8x36xf32, #tpu.memory_space<vmem>>, vector<8x8x4xf32>
    tpu.vector_store %arg10[%c0_63, %c0_64, %c24], %28 {strides = array<i32>} : memref<8x8x36xf32, #tpu.memory_space<vmem>>, vector<8x8x4xf32>,
    %c2_65 = arith.constant 2 : index
    %c0_66 = arith.constant 0 : index
    %c0_67 = arith.constant 0 : index
    %30 = tpu.strided_load %arg9[%c2_65, %c0_66, %c0_67] {strides = array<i32: 2, 1, 1>} : memref<18x8x4xf32, #tpu.memory_space<vmem>>, vector<8x8x4xf32>
    %c0_68 = arith.constant 0 : index
    %c0_69 = arith.constant 0 : index
    %c28 = arith.constant 28 : index
    %31 = vector.load %arg10[%c0_68, %c0_69, %c28] : memref<8x8x36xf32, #tpu.memory_space<vmem>>, vector<8x8x4xf32>
    tpu.vector_store %arg10[%c0_68, %c0_69, %c28], %30 {strides = array<i32>} : memref<8x8x36xf32, #tpu.memory_space<vmem>>, vector<8x8x4xf32>,
    %c2_70 = arith.constant 2 : index
    %c1_71 = arith.constant 1 : index
    %c0_72 = arith.constant 0 : index
    %32 = tpu.strided_load %arg8[%c2_70, %c1_71, %c0_72] {strides = array<i32: 2, 1, 1>} : memref<18x9x4xf32, #tpu.memory_space<vmem>>, vector<8x8x4xf32>
    %c0_73 = arith.constant 0 : index
    %c0_74 = arith.constant 0 : index
    %c32 = arith.constant 32 : index
    %33 = vector.load %arg10[%c0_73, %c0_74, %c32] : memref<8x8x36xf32, #tpu.memory_space<vmem>>, vector<8x8x4xf32>
    tpu.vector_store %arg10[%c0_73, %c0_74, %c32], %32 {strides = array<i32>} : memref<8x8x36xf32, #tpu.memory_space<vmem>>, vector<8x8x4xf32>,
    %c0_75 = arith.constant 0 : index
    %c0_76 = arith.constant 0 : index
    %c0_77 = arith.constant 0 : index
    %34 = vector.load %arg10[%c0_75, %c0_76, %c0_77] : memref<8x8x36xf32, #tpu.memory_space<vmem>>, vector<8x8x36xf32>
    %35 = vector.shape_cast %34 : vector<8x8x36xf32> to vector<64x36xf32>
    %c0_78 = arith.constant 0 : index
    %c0_79 = arith.constant 0 : index
    %36 = vector.load %arg2[%c0_78, %c0_79] : memref<36x8xf32, #tpu.memory_space<vmem>>, vector<36x8xf32>
    %cst_80 = arith.constant dense<0.000000e+00> : vector<64x8xf32>
    %37 = tpu.matmul %35, %36, %cst_80 {dimension_numbers = #tpu.dot_dimension_numbers<[1], [0], [0], [1], [0, 0, 1, 1], [], []>} : vector<64x36xf32>, vector<36x8xf32>, vector<64x8xf32> -> vector<64x8xf32>
    %38 = vector.shape_cast %37 : vector<64x8xf32> to vector<8x8x8xf32>
    %c0_81 = arith.constant 0 : index
    %c0_82 = arith.constant 0 : index
    %39 = vector.load %arg3[%c0_81, %c0_82] : memref<1x8xf32, #tpu.memory_space<vmem>>, vector<1x8xf32>
    %40 = vector.shape_cast %39 : vector<1x8xf32> to vector<1x1x8xf32>
    %41 = vector.broadcast %40 : vector<1x1x8xf32> to vector<8x8x8xf32>
    %42 = arith.addf %38, %41 : vector<8x8x8xf32>
    %c0_83 = arith.constant 0 : index
    %c0_84 = arith.constant 0 : index
    %c0_85 = arith.constant 0 : index
    %c0_86 = arith.constant 0 : index
    %43 = vector.load %arg6[%c0_83, %c0_84, %c0_85, %c0_86] : memref<1x8x8x8xf32, #tpu.memory_space<vmem>>, vector<1x8x8x8xf32>
    %44 = vector.shape_cast %43 : vector<1x8x8x8xf32> to vector<8x8x8xf32>
    %45 = vector.shape_cast %42 : vector<8x8x8xf32> to vector<1x8x8x8xf32>
    tpu.vector_store %arg6[%c0_83, %c0_84, %c0_85, %c0_86], %45 {strides = array<i32>} : memref<1x8x8x8xf32, #tpu.memory_space<vmem>>, vector<1x8x8x8xf32>,
    %cst_87 = arith.constant 0.000000e+00 : f32
    %46 = vector.broadcast %cst_87 : f32 to vector<1x5x8xf32>
    %c0_88 = arith.constant 0 : index
    %c0_89 = arith.constant 0 : index
    %c0_90 = arith.constant 0 : index
    %47 = vector.load %arg11[%c0_88, %c0_89, %c0_90] : memref<10x5x8xf32, #tpu.memory_space<vmem>>, vector<1x5x8xf32>
    tpu.vector_store %arg11[%c0_88, %c0_89, %c0_90], %46 {strides = array<i32>} : memref<10x5x8xf32, #tpu.memory_space<vmem>>, vector<1x5x8xf32>,
    %cst_91 = arith.constant 0.000000e+00 : f32
    %48 = vector.broadcast %cst_91 : f32 to vector<1x4x8xf32>
    %c0_92 = arith.constant 0 : index
    %c0_93 = arith.constant 0 : index
    %c0_94 = arith.constant 0 : index
    %49 = vector.load %arg12[%c0_92, %c0_93, %c0_94] : memref<10x4x8xf32, #tpu.memory_space<vmem>>, vector<1x4x8xf32>
    tpu.vector_store %arg12[%c0_92, %c0_93, %c0_94], %48 {strides = array<i32>} : memref<10x4x8xf32, #tpu.memory_space<vmem>>, vector<1x4x8xf32>,
    %cst_95 = arith.constant 0.000000e+00 : f32
    %50 = vector.broadcast %cst_95 : f32 to vector<1x5x8xf32>
    %c9 = arith.constant 9 : index
    %c0_96 = arith.constant 0 : index
    %c0_97 = arith.constant 0 : index
    %51 = vector.load %arg11[%c9, %c0_96, %c0_97] : memref<10x5x8xf32, #tpu.memory_space<vmem>>, vector<1x5x8xf32>
    tpu.vector_store %arg11[%c9, %c0_96, %c0_97], %50 {strides = array<i32>} : memref<10x5x8xf32, #tpu.memory_space<vmem>>, vector<1x5x8xf32>,
    %cst_98 = arith.constant 0.000000e+00 : f32
    %52 = vector.broadcast %cst_98 : f32 to vector<1x4x8xf32>
    %c9_99 = arith.constant 9 : index
    %c0_100 = arith.constant 0 : index
    %c0_101 = arith.constant 0 : index
    %53 = vector.load %arg12[%c9_99, %c0_100, %c0_101] : memref<10x4x8xf32, #tpu.memory_space<vmem>>, vector<1x4x8xf32>
    tpu.vector_store %arg12[%c9_99, %c0_100, %c0_101], %52 {strides = array<i32>} : memref<10x4x8xf32, #tpu.memory_space<vmem>>, vector<1x4x8xf32>,
    %cst_102 = arith.constant 0.000000e+00 : f32
    %54 = vector.broadcast %cst_102 : f32 to vector<10x1x8xf32>
    %c0_103 = arith.constant 0 : index
    %c0_104 = arith.constant 0 : index
    %c0_105 = arith.constant 0 : index
    %55 = vector.load %arg11[%c0_103, %c0_104, %c0_105] : memref<10x5x8xf32, #tpu.memory_space<vmem>>, vector<10x1x8xf32>
    tpu.vector_store %arg11[%c0_103, %c0_104, %c0_105], %54 {strides = array<i32>} : memref<10x5x8xf32, #tpu.memory_space<vmem>>, vector<10x1x8xf32>,
    %c0_106 = arith.constant 0 : index
    %c0_107 = arith.constant 0 : index
    %c1_108 = arith.constant 1 : index
    %c0_109 = arith.constant 0 : index
    %56 = tpu.strided_load %arg6[%c0_106, %c0_107, %c1_108, %c0_109] {strides = array<i32: 1, 1, 2, 1>} : memref<1x8x8x8xf32, #tpu.memory_space<vmem>>, vector<1x8x4x8xf32>
    %57 = vector.shape_cast %56 : vector<1x8x4x8xf32> to vector<8x4x8xf32>
    %cst_110 = arith.constant 0.000000e+00 : f32
    %58 = vector.broadcast %cst_110 : f32 to vector<8x4x8xf32>
    %59 = arith.maximumf %57, %58 : vector<8x4x8xf32>
    %c1_111 = arith.constant 1 : index
    %c1_112 = arith.constant 1 : index
    %c0_113 = arith.constant 0 : index
    %60 = vector.load %arg11[%c1_111, %c1_112, %c0_113] : memref<10x5x8xf32, #tpu.memory_space<vmem>>, vector<8x4x8xf32>
    tpu.vector_store %arg11[%c1_111, %c1_112, %c0_113], %59 {strides = array<i32>} : memref<10x5x8xf32, #tpu.memory_space<vmem>>, vector<8x4x8xf32>,
    %c0_114 = arith.constant 0 : index
    %c0_115 = arith.constant 0 : index
    %c0_116 = arith.constant 0 : index
    %c0_117 = arith.constant 0 : index
    %61 = tpu.strided_load %arg6[%c0_114, %c0_115, %c0_116, %c0_117] {strides = array<i32: 1, 1, 2, 1>} : memref<1x8x8x8xf32, #tpu.memory_space<vmem>>, vector<1x8x4x8xf32>
    %62 = vector.shape_cast %61 : vector<1x8x4x8xf32> to vector<8x4x8xf32>
    %cst_118 = arith.constant 0.000000e+00 : f32
    %63 = vector.broadcast %cst_118 : f32 to vector<8x4x8xf32>
    %64 = arith.maximumf %62, %63 : vector<8x4x8xf32>
    %c1_119 = arith.constant 1 : index
    %c0_120 = arith.constant 0 : index
    %c0_121 = arith.constant 0 : index
    %65 = vector.load %arg12[%c1_119, %c0_120, %c0_121] : memref<10x4x8xf32, #tpu.memory_space<vmem>>, vector<8x4x8xf32>
    tpu.vector_store %arg12[%c1_119, %c0_120, %c0_121], %64 {strides = array<i32>} : memref<10x4x8xf32, #tpu.memory_space<vmem>>, vector<8x4x8xf32>,
    %cst_122 = arith.constant 0.000000e+00 : f32
    %66 = vector.broadcast %cst_122 : f32 to vector<4x4x72xf32>
    %c0_123 = arith.constant 0 : index
    %c4_124 = arith.constant 4 : index
    %c0_125 = arith.constant 0 : index
    %67 = vector.load %arg13[%c0_123, %c4_124, %c0_125] : memref<4x8x72xf32, #tpu.memory_space<vmem>>, vector<4x4x72xf32>
    tpu.vector_store %arg13[%c0_123, %c4_124, %c0_125], %66 {strides = array<i32>} : memref<4x8x72xf32, #tpu.memory_space<vmem>>, vector<4x4x72xf32>,
    %c0_126 = arith.constant 0 : index
    %c0_127 = arith.constant 0 : index
    %c0_128 = arith.constant 0 : index
    %68 = tpu.strided_load %arg11[%c0_126, %c0_127, %c0_128] {strides = array<i32: 2, 1, 1>} : memref<10x5x8xf32, #tpu.memory_space<vmem>>, vector<4x4x8xf32>
    %c0_129 = arith.constant 0 : index
    %c0_130 = arith.constant 0 : index
    %c0_131 = arith.constant 0 : index
    %69 = vector.load %arg13[%c0_129, %c0_130, %c0_131] : memref<4x8x72xf32, #tpu.memory_space<vmem>>, vector<4x4x8xf32>
    tpu.vector_store %arg13[%c0_129, %c0_130, %c0_131], %68 {strides = array<i32>} : memref<4x8x72xf32, #tpu.memory_space<vmem>>, vector<4x4x8xf32>,
    %c0_132 = arith.constant 0 : index
    %c0_133 = arith.constant 0 : index
    %c0_134 = arith.constant 0 : index
    %70 = tpu.strided_load %arg12[%c0_132, %c0_133, %c0_134] {strides = array<i32: 2, 1, 1>} : memref<10x4x8xf32, #tpu.memory_space<vmem>>, vector<4x4x8xf32>
    %c0_135 = arith.constant 0 : index
    %c0_136 = arith.constant 0 : index
    %c8_137 = arith.constant 8 : index
    %71 = vector.load %arg13[%c0_135, %c0_136, %c8_137] : memref<4x8x72xf32, #tpu.memory_space<vmem>>, vector<4x4x8xf32>
    tpu.vector_store %arg13[%c0_135, %c0_136, %c8_137], %70 {strides = array<i32>} : memref<4x8x72xf32, #tpu.memory_space<vmem>>, vector<4x4x8xf32>,
    %c0_138 = arith.constant 0 : index
    %c1_139 = arith.constant 1 : index
    %c0_140 = arith.constant 0 : index
    %72 = tpu.strided_load %arg11[%c0_138, %c1_139, %c0_140] {strides = array<i32: 2, 1, 1>} : memref<10x5x8xf32, #tpu.memory_space<vmem>>, vector<4x4x8xf32>
    %c0_141 = arith.constant 0 : index
    %c0_142 = arith.constant 0 : index
    %c16_143 = arith.constant 16 : index
    %73 = vector.load %arg13[%c0_141, %c0_142, %c16_143] : memref<4x8x72xf32, #tpu.memory_space<vmem>>, vector<4x4x8xf32>
    tpu.vector_store %arg13[%c0_141, %c0_142, %c16_143], %72 {strides = array<i32>} : memref<4x8x72xf32, #tpu.memory_space<vmem>>, vector<4x4x8xf32>,
    %c1_144 = arith.constant 1 : index
    %c0_145 = arith.constant 0 : index
    %c0_146 = arith.constant 0 : index
    %74 = tpu.strided_load %arg11[%c1_144, %c0_145, %c0_146] {strides = array<i32: 2, 1, 1>} : memref<10x5x8xf32, #tpu.memory_space<vmem>>, vector<4x4x8xf32>
    %c0_147 = arith.constant 0 : index
    %c0_148 = arith.constant 0 : index
    %c24_149 = arith.constant 24 : index
    %75 = vector.load %arg13[%c0_147, %c0_148, %c24_149] : memref<4x8x72xf32, #tpu.memory_space<vmem>>, vector<4x4x8xf32>
    tpu.vector_store %arg13[%c0_147, %c0_148, %c24_149], %74 {strides = array<i32>} : memref<4x8x72xf32, #tpu.memory_space<vmem>>, vector<4x4x8xf32>,
    %c1_150 = arith.constant 1 : index
    %c0_151 = arith.constant 0 : index
    %c0_152 = arith.constant 0 : index
    %76 = tpu.strided_load %arg12[%c1_150, %c0_151, %c0_152] {strides = array<i32: 2, 1, 1>} : memref<10x4x8xf32, #tpu.memory_space<vmem>>, vector<4x4x8xf32>
    %c0_153 = arith.constant 0 : index
    %c0_154 = arith.constant 0 : index
    %c32_155 = arith.constant 32 : index
    %77 = vector.load %arg13[%c0_153, %c0_154, %c32_155] : memref<4x8x72xf32, #tpu.memory_space<vmem>>, vector<4x4x8xf32>
    tpu.vector_store %arg13[%c0_153, %c0_154, %c32_155], %76 {strides = array<i32>} : memref<4x8x72xf32, #tpu.memory_space<vmem>>, vector<4x4x8xf32>,
    %c1_156 = arith.constant 1 : index
    %c1_157 = arith.constant 1 : index
    %c0_158 = arith.constant 0 : index
    %78 = tpu.strided_load %arg11[%c1_156, %c1_157, %c0_158] {strides = array<i32: 2, 1, 1>} : memref<10x5x8xf32, #tpu.memory_space<vmem>>, vector<4x4x8xf32>
    %c0_159 = arith.constant 0 : index
    %c0_160 = arith.constant 0 : index
    %c40 = arith.constant 40 : index
    %79 = vector.load %arg13[%c0_159, %c0_160, %c40] : memref<4x8x72xf32, #tpu.memory_space<vmem>>, vector<4x4x8xf32>
    tpu.vector_store %arg13[%c0_159, %c0_160, %c40], %78 {strides = array<i32>} : memref<4x8x72xf32, #tpu.memory_space<vmem>>, vector<4x4x8xf32>,
    %c2_161 = arith.constant 2 : index
    %c0_162 = arith.constant 0 : index
    %c0_163 = arith.constant 0 : index
    %80 = tpu.strided_load %arg11[%c2_161, %c0_162, %c0_163] {strides = array<i32: 2, 1, 1>} : memref<10x5x8xf32, #tpu.memory_space<vmem>>, vector<4x4x8xf32>
    %c0_164 = arith.constant 0 : index
    %c0_165 = arith.constant 0 : index
    %c48 = arith.constant 48 : index
    %81 = vector.load %arg13[%c0_164, %c0_165, %c48] : memref<4x8x72xf32, #tpu.memory_space<vmem>>, vector<4x4x8xf32>
    tpu.vector_store %arg13[%c0_164, %c0_165, %c48], %80 {strides = array<i32>} : memref<4x8x72xf32, #tpu.memory_space<vmem>>, vector<4x4x8xf32>,
    %c2_166 = arith.constant 2 : index
    %c0_167 = arith.constant 0 : index
    %c0_168 = arith.constant 0 : index
    %82 = tpu.strided_load %arg12[%c2_166, %c0_167, %c0_168] {strides = array<i32: 2, 1, 1>} : memref<10x4x8xf32, #tpu.memory_space<vmem>>, vector<4x4x8xf32>
    %c0_169 = arith.constant 0 : index
    %c0_170 = arith.constant 0 : index
    %c56 = arith.constant 56 : index
    %83 = vector.load %arg13[%c0_169, %c0_170, %c56] : memref<4x8x72xf32, #tpu.memory_space<vmem>>, vector<4x4x8xf32>
    tpu.vector_store %arg13[%c0_169, %c0_170, %c56], %82 {strides = array<i32>} : memref<4x8x72xf32, #tpu.memory_space<vmem>>, vector<4x4x8xf32>,
    %c2_171 = arith.constant 2 : index
    %c1_172 = arith.constant 1 : index
    %c0_173 = arith.constant 0 : index
    %84 = tpu.strided_load %arg11[%c2_171, %c1_172, %c0_173] {strides = array<i32: 2, 1, 1>} : memref<10x5x8xf32, #tpu.memory_space<vmem>>, vector<4x4x8xf32>
    %c0_174 = arith.constant 0 : index
    %c0_175 = arith.constant 0 : index
    %c64 = arith.constant 64 : index
    %85 = vector.load %arg13[%c0_174, %c0_175, %c64] : memref<4x8x72xf32, #tpu.memory_space<vmem>>, vector<4x4x8xf32>
    tpu.vector_store %arg13[%c0_174, %c0_175, %c64], %84 {strides = array<i32>} : memref<4x8x72xf32, #tpu.memory_space<vmem>>, vector<4x4x8xf32>,
    %c0_176 = arith.constant 0 : index
    %c0_177 = arith.constant 0 : index
    %c0_178 = arith.constant 0 : index
    %86 = vector.load %arg13[%c0_176, %c0_177, %c0_178] : memref<4x8x72xf32, #tpu.memory_space<vmem>>, vector<4x8x72xf32>
    %87 = vector.shape_cast %86 : vector<4x8x72xf32> to vector<32x72xf32>
    %c0_179 = arith.constant 0 : index
    %c0_180 = arith.constant 0 : index
    %88 = vector.load %arg4[%c0_179, %c0_180] : memref<72x8xf32, #tpu.memory_space<vmem>>, vector<72x8xf32>
    %cst_181 = arith.constant dense<0.000000e+00> : vector<32x8xf32>
    %89 = tpu.matmul %87, %88, %cst_181 {dimension_numbers = #tpu.dot_dimension_numbers<[1], [0], [0], [1], [0, 0, 1, 1], [], []>} : vector<32x72xf32>, vector<72x8xf32>, vector<32x8xf32> -> vector<32x8xf32>
    %90 = vector.shape_cast %89 : vector<32x8xf32> to vector<4x8x8xf32>
    %91 = vector.extract_strided_slice %90 {offsets = [0, 0, 0], sizes = [4, 4, 8], strides = [1, 1, 1]} : vector<4x8x8xf32> to vector<4x4x8xf32>
    %c0_182 = arith.constant 0 : index
    %c0_183 = arith.constant 0 : index
    %92 = vector.load %arg5[%c0_182, %c0_183] : memref<1x8xf32, #tpu.memory_space<vmem>>, vector<1x8xf32>
    %93 = vector.shape_cast %92 : vector<1x8xf32> to vector<1x1x8xf32>
    %94 = vector.broadcast %93 : vector<1x1x8xf32> to vector<4x4x8xf32>
    %95 = arith.addf %91, %94 : vector<4x4x8xf32>
    %c0_184 = arith.constant 0 : index
    %c0_185 = arith.constant 0 : index
    %c0_186 = arith.constant 0 : index
    %c0_187 = arith.constant 0 : index
    %96 = vector.load %arg7[%c0_184, %c0_185, %c0_186, %c0_187] : memref<1x4x4x8xf32, #tpu.memory_space<vmem>>, vector<1x4x4x8xf32>
    %97 = vector.shape_cast %96 : vector<1x4x4x8xf32> to vector<4x4x8xf32>
    %98 = vector.shape_cast %95 : vector<4x4x8xf32> to vector<1x4x4x8xf32>
    tpu.vector_store %arg7[%c0_184, %c0_185, %c0_186, %c0_187], %98 {strides = array<i32>} : memref<1x4x4x8xf32, #tpu.memory_space<vmem>>, vector<1x4x4x8xf32>,
    return
  }
  func.func @transform_0(%arg0: i32) -> (i32, i32, i32, i32) {
    %c0_i32 = arith.constant 0 : i32
    %c0_i32_0 = arith.constant 0 : i32
    %c0_i32_1 = arith.constant 0 : i32
    %c0_i32_2 = arith.constant 0 : i32
    return %arg0, %c0_i32, %c0_i32_0, %c0_i32_1 : i32, i32, i32, i32
  }
  func.func @transform_1(%arg0: i32) -> (i32, i32) {
    %c0_i32 = arith.constant 0 : i32
    %c0_i32_0 = arith.constant 0 : i32
    %c0_i32_1 = arith.constant 0 : i32
    return %c0_i32, %c0_i32_0 : i32, i32
  }
  func.func @transform_2(%arg0: i32) -> (i32, i32) {
    %c0_i32 = arith.constant 0 : i32
    %c0_i32_0 = arith.constant 0 : i32
    %c0_i32_1 = arith.constant 0 : i32
    return %c0_i32, %c0_i32_0 : i32, i32
  }
  func.func @transform_3(%arg0: i32) -> (i32, i32) {
    %c0_i32 = arith.constant 0 : i32
    %c0_i32_0 = arith.constant 0 : i32
    %c0_i32_1 = arith.constant 0 : i32
    return %c0_i32, %c0_i32_0 : i32, i32
  }
  func.func @transform_4(%arg0: i32) -> (i32, i32) {
    %c0_i32 = arith.constant 0 : i32
    %c0_i32_0 = arith.constant 0 : i32
    %c0_i32_1 = arith.constant 0 : i32
    return %c0_i32, %c0_i32_0 : i32, i32
  }
  func.func @transform_5(%arg0: i32) -> (i32, i32, i32, i32) {
    %c0_i32 = arith.constant 0 : i32
    %c0_i32_0 = arith.constant 0 : i32
    %c0_i32_1 = arith.constant 0 : i32
    %c0_i32_2 = arith.constant 0 : i32
    return %arg0, %c0_i32, %c0_i32_0, %c0_i32_1 : i32, i32, i32, i32
  }
  func.func @transform_6(%arg0: i32) -> (i32, i32, i32, i32) {
    %c0_i32 = arith.constant 0 : i32
    %c0_i32_0 = arith.constant 0 : i32
    %c0_i32_1 = arith.constant 0 : i32
    %c0_i32_2 = arith.constant 0 : i32
    return %arg0, %c0_i32, %c0_i32_0, %c0_i32_1 : i32, i32, i32, i32
  }
}

</mosaic_0001>

<bundles_post_ra>
// kernel: _forward_nchw.1
= control target key start
LH: loop header
LB: loop body
LE: loop exit
PB: predicated region body
PF: predicated region fallthrough
CT: control target
= control target key end

     0   :  { %12 = vsyncpa [#allocation9], 0  ;;  %s2200_s0 = inlined_call_operand.vmem [shape: f32[2,16,16,4], index: 0, kind: input, shape index: {}]   ;;  %s2201_s1 = inlined_call_operand.vmem [shape: f32[36,8], index: 1, kind: input, shape index: {}]   ;;  %s2202_s2 = inlined_call_operand.vmem [shape: f32[1,8], index: 2, kind: input, shape index: {}]   ;;  %s2203_s3 = inlined_call_operand.vmem [shape: f32[72,8], index: 3, kind: input, shape index: {}]   ;;  %s2204_s4 = inlined_call_operand.vmem [shape: f32[1,8], index: 4, kind: input, shape index: {}]   ;;  %s2205_s5 = inlined_call_operand.vmem [shape: f32[2,8,8,8], index: 5, kind: output, shape index: {0}]   ;;  %s2206_s6 = inlined_call_operand.hbm [shape: f32[2,4,4,8], index: 6, kind: output, shape index: {1}]  }
   0x1   :  { %14 = vsyncpa [#allocation9 + $0x1], 0  ;;  %s1635_s21 = smov 0   ;;  %s1637_s22 = smov 0  }
   0x2   :  { %s1639_s23 = smov 0   ;;  %s1641_s24 = smov 0  }
   0x3 LB: > { %s1656_s25 = sadd.s32 4294967295, %s1585_s24   ;;  %s1379_s26 = sadd.s32 4294967294, %s1585_s24   ;;  %s1585_s24 = sphi %s1641_s24, %s2215_s24   ;;  %s1581_s23 = sphi %s1639_s23, %s2214_s23   ;;  %s1577_s22 = sphi %s1637_s22, %s2213_s22   ;;  %s1573_s21 = sphi %s1635_s21, %s2212_s21  }
   0x4   : > { %s1660_s27 = sadd.s32 1, %s1585_s24   ;;  %s163_s28 = sadd.s32 1, %s1581_s23 }
   0x5   : > { %s160_s29 = ssub.s32 %s1585_s24, %s1660_s27  ;;  %p173_p0 = scmp.ne.s32.totalorder %s1581_s23, %s1577_s22 }
   0x6   : > { %p161_p1 = scmp.eq.s32.totalorder %s160_s29, 0  ;;  %p174_p2 = scmp.eq.s32.totalorder %s1656_s25, 1 }
   0x7   : > { %p179_p3 = scmp.ne.s32.totalorder %s1577_s22, %s1573_s21  ;;  %p180_p4 = scmp.eq.s32.totalorder %s1379_s26, 1 }
   0x8   : > { %s1671_s30 = scalar_select %p161_p1, %s1581_s23, %s163_s28  }
   0x9   : > { %p1673_p5 = por %p174_p2, %p173_p0  ;;  %p1677_p6 = por %p180_p4, %p179_p3 }
   0xa   : > { %p1382_p7 = scmp.ge.s32.totalorder %s1585_s24, 1  ;;  %p218_p8 = scmp.lt.s32.totalorder %s1585_s24, 3 }
   0xc   : > { %p219_p9 = pnand %p1382_p7, %p218_p8 }
   0xd   : > { %p253_p10 = scmp.lt.s32.totalorder (!%p219_p9), %s1656_s25, 1  ;;  %s1588_s14 = smov (!%p219_p9), 4  }
   0xe   : > { %222 = sbr.rel (%p219_p9) target bundleno = 751 (0x2ef), region = 40  ;;  %s1589_s15 = smov (!%p219_p9), 12  }
   0xf   : > { %s1590_s16 = smov (!%p219_p9), 8   ;;  %s2207_s17 = smov (!%p219_p9), 16  }
  0x10   : > { %s1592_s18 = smov (!%p219_p9), 20   ;;  %s1593_s19 = smov (!%p219_p9), 28  }
  0x11   : > { %s1594_s20 = smov (!%p219_p9), 24   ;;  %s1595_s26 = smov (!%p219_p9), 32  }
  0x12   : > { %s2211_s11 = smov (!%p219_p9), 16   ;;  %s1597_s29 = smov (!%p219_p9), 48  }
  0x13   : > { %vm263_vm0 = vcmask 31744   ;;  %v1587_v0 = vmov 0.0   ;;  %s1689_s9 = scalar_select %p253_p10, %s1656_s25, 1  ;;  %vm265_vm1 = vcmask 24576   ;;  %vm493_vm2 = vcmask 97344  }
  0x14   : > { %267 = vst.msk [vmem:[#allocation3] sm:$0xff] %vm263_vm0, %v1587_v0  ;;  %vm444_vm3 = vcmask 64544   ;;  %vm836_vm4 = vcmask 1043456   ;;  %vm542_vm5 = vcmask 130144   ;;  %vm591_vm6 = vcmask 162944   ;;  %s1543_s12 = scalar_lea.hbm %s2206_s6, 32 }
  0x15   : > { %264 = vst.msk [vmem:[#allocation2] sm:$0xff] %vm263_vm0, %v1587_v0  ;;  %s1452_s10 = sshll.u32 %s1689_s9, 8  ;;  %vm640_vm7 = vcmask 195744   ;;  %vm690_vm8 = vcmask 228544   ;;  %vm740_vm9 = vcmask 261344   ;;  %vm789_vm10 = vcmask 294144  }
  0x16   : > { %s1695_s13 = scalar_lea.vmem %s2200_s0, %s1452_s10  ;;  %280 = vst.msk [vmem:[#allocation2 + $0x70] sm:$0x1] %vm265_vm1, %v1587_v0  ;;  %vm811_vm11 = vcmask 293888   ;;  %vm904_vm12 = vcmask 60416   ;;  %vm902_vm13 = vcmask 61440   ;;  %vm910_vm14 = vcmask 57344  }
  0x17   : > { %v1408_v1 = vld [vmem:[%s1695_s13 + $0x50] ss:$2 sm:$0xff]  ;;  %v1394_v2 = vld [vmem:[%s1695_s13 + $0x61] ss:$2 sm:$0xff]  ;;  %266 = vst.msk [vmem:[#allocation2 + $0x8] sm:$0x1] %vm265_vm1, %v1587_v0 }
  0x18   : > { %377 = vst.msk [vmem:[#allocation3 + $0x30] sm:$0xff] %vm263_vm0, %v1408_v1  ;;  %v1393_v7 = vld [vmem:[%s1695_s13 + $0x51] ss:$2 sm:$0xff]  ;;  %v1388_v8 = vld [vmem:[%s1695_s13 + $0x1] ss:$2 sm:$0xff]  ;;  %vm893_vm15 = vcmask 64512  }
  0x19   : > { %330 = vst.msk [vmem:[#allocation2 + $0x71] sm:$0xff] %vm263_vm0, %v1394_v2  ;;  %v1410_v9 = vld [vmem:[%s1695_s13 + $0x70] ss:$2 sm:$0xff]  ;;  %v340_v10 = vld [vmem:[%s1695_s13] ss:$2 sm:$0xff]  ;;  %s1599_s10 = smov 64  }
  0x1a   : > { %273 = vst.msk [vmem:[#allocation2] sm:$0x1] %vm265_vm1, %v1587_v0  ;;  %v1395_v11 = vld [vmem:[%s1695_s13 + $0x71] ss:$2 sm:$0xff]  ;;  %v1409_v12 = vld [vmem:[%s1695_s13 + $0x60] ss:$2 sm:$0xff] }
  0x1b   : > { %v404_v3 = vld [vmem:[#allocation3] sm:$0xff]  ;;  %274 = vst.msk [vmem:[#allocation2 + $0x10] sm:$0x1] %vm265_vm1, %v1587_v0  ;;  %v1404_v13 = vld [vmem:[%s1695_s13 + $0x10] ss:$2 sm:$0xff] }
  0x1c   : > { %420 = vrot.lane.b32.xlu1 %v404_v3, %s1588_s14  ;;  %275 = vst.msk [vmem:[#allocation2 + $0x20] sm:$0x1] %vm265_vm1, %v1587_v0  ;;  %v1389_v15 = vld [vmem:[%s1695_s13 + $0x11] ss:$2 sm:$0xff]  ;;  %v1396_v17 = vld [vmem:[%s1695_s13 + $0x81] ss:$2 sm:$0xff] }
  0x1d   : > { %276 = vst.msk [vmem:[#allocation2 + $0x30] sm:$0x1] %vm265_vm1, %v1587_v0  ;;  %v1405_v22 = vld [vmem:[%s1695_s13 + $0x20] ss:$2 sm:$0xff]  ;;  %v1397_v24 = vld [vmem:[%s1695_s13 + $0x91] ss:$2 sm:$0xff] }
  0x1e   : > { %277 = vst.msk [vmem:[#allocation2 + $0x40] sm:$0x1] %vm265_vm1, %v1587_v0  ;;  %v453_v6 = vld [vmem:[#allocation2 + $0x1] sm:$0xff]  ;;  %v1391_v32 = vld [vmem:[%s1695_s13 + $0x31] ss:$2 sm:$0xff] }
  0x1f   : > { %v1712_v4 = vld [vmem:[#allocation3 + $0x30] sm:$0xff]  ;;  %278 = vst.msk [vmem:[#allocation2 + $0x50] sm:$0x1] %vm265_vm1, %v1587_v0  ;;  %469 = vrot.lane.b32.xlu2 %v453_v6, %s1590_s16  ;;  %v1390_v29 = vld [vmem:[%s1695_s13 + $0x21] ss:$2 sm:$0xff] }
  0x20   : > { %426 = vrot.lane.b32.xlu0 %v1712_v4, %s1588_s14  ;;  %v505_v5 = vld [vmem:[#allocation2 + $0x70] sm:$0xff]  ;;  %279 = vst.msk [vmem:[#allocation2 + $0x60] sm:$0x1] %vm265_vm1, %v1587_v0  ;;  %v1411_v30 = vld [vmem:[%s1695_s13 + $0x80] ss:$2 sm:$0xff] }
  0x21   : > { %281 = vst.msk [vmem:[#allocation2 + $0x80] sm:$0x1] %vm265_vm1, %v1587_v0  ;;  %v603_v20 = vld [vmem:[#allocation2 + $0x71] sm:$0xff]  ;;  %v1398_v36 = vld [vmem:[%s1695_s13 + $0xa1] ss:$2 sm:$0xff] }
  0x22   : > { %282 = vst.msk [vmem:[#allocation2 + $0x90] sm:$0x1] %vm265_vm1, %v1587_v0  ;;  %v1412_v37 = vld [vmem:[%s1695_s13 + $0x90] ss:$2 sm:$0xff]  ;;  %v1413_v41 = vld [vmem:[%s1695_s13 + $0xa0] ss:$2 sm:$0xff] }
  0x23   : > { %283 = vst.msk [vmem:[#allocation2 + $0xa0] sm:$0x1] %vm265_vm1, %v1587_v0  ;;  %v1392_v44 = vld [vmem:[%s1695_s13 + $0x41] ss:$2 sm:$0xff]  ;;  %v1406_v45 = vld [vmem:[%s1695_s13 + $0x30] ss:$2 sm:$0xff] }
  0x24   : > { %524 = vrot.lane.b32.xlu1 %v505_v5, %s1589_s15  ;;  %284 = vst.msk [vmem:[#allocation2 + $0xb0] sm:$0x1] %vm265_vm1, %v1587_v0  ;;  %v1399_v47 = vld [vmem:[%s1695_s13 + $0xb1] ss:$2 sm:$0xff]  ;;  %v1414_v49 = vld [vmem:[%s1695_s13 + $0xb0] ss:$2 sm:$0xff] }
  0x25   : > { %285 = vst.msk [vmem:[#allocation2 + $0xc0] sm:$0x1] %vm265_vm1, %v1587_v0  ;;  %v388_v50 = vld [vmem:[#allocation2] sm:$0xff]  ;;  %v1416_v5 = vld [vmem:[%s1695_s13 + $0xd0] ss:$2 sm:$0xff] }
  0x26   : > { %286 = vst.msk [vmem:[#allocation2 + $0xd0] sm:$0x1] %vm265_vm1, %v1587_v0  ;;  %v1407_v56 = vld [vmem:[%s1695_s13 + $0x40] ss:$2 sm:$0xff]  ;;  %v1400_v57 = vld [vmem:[%s1695_s13 + $0xc1] ss:$2 sm:$0xff] }
  0x27   : > { %287 = vst.msk [vmem:[#allocation2 + $0xe0] sm:$0x1] %vm265_vm1, %v1587_v0  ;;  %v1415_v60 = vld [vmem:[%s1695_s13 + $0xc0] ss:$2 sm:$0xff] }
  0x28   : > { %288 = vst.msk [vmem:[#allocation2 + $0xf0] sm:$0x1] %vm265_vm1, %v1587_v0 }
  0x29   : > { %289 = vst.msk [vmem:[#allocation2 + $0x100] sm:$0x1] %vm265_vm1, %v1587_v0  ;;  %vm1044_vm1 = vcmask 191616  }
  0x2a   : > { %329 = vst.msk [vmem:[#allocation2 + $0x61] sm:$0xff] %vm263_vm0, %v1393_v7  ;;  %v1401_v7 = vld [vmem:[%s1695_s13 + $0xd1] ss:$2 sm:$0xff] }
  0x2b   : > { %324 = vst.msk [vmem:[#allocation2 + $0x11] sm:$0xff] %vm263_vm0, %v1388_v8 }
  0x2c   : > { %379 = vst.msk [vmem:[#allocation3 + $0x40] sm:$0xff] %vm263_vm0, %v1410_v9 }
  0x2d   : > { %372 = vst.msk [vmem:[#allocation3 + $0x8] sm:$0xff] %vm263_vm0, %v340_v10  ;;  %v810_v10 = vld [vmem:[%s2201_s1 + $0x20] sm:$0xf] }
  0x2e   : > { %331 = vst.msk [vmem:[#allocation2 + $0x81] sm:$0xff] %vm263_vm0, %v1395_v11  ;;  %1455 = vmatpush.msk.msra.mxu2 %vm836_vm4, %v810_v10  ;;  %1419 = vmatpush.msk.msra.mxu0 %vm836_vm4, %v810_v10  ;;  %vm1119_vm4 = vcmask 388416  }
  0x2f   : > { %378 = vst.msk [vmem:[#allocation3 + $0x38] sm:$0xff] %vm263_vm0, %v1409_v12 }
  0x30   : > { %373 = vst.msk [vmem:[#allocation3 + $0x10] sm:$0xff] %vm263_vm0, %v1404_v13  ;;  %v809_v13 = vld [vmem:[%s2201_s1 + $0x18] sm:$0xff] }
  0x31   : > { %v1758_v14 = vld [vmem:[#allocation2 + $0x61] sm:$0xff]  ;;  %325 = vst.msk [vmem:[#allocation2 + $0x21] sm:$0xff] %vm263_vm0, %v1389_v15  ;;  %1456 = vmatpush.msra.mxu2 %v809_v13  ;;  %v808_v15 = vld [vmem:[%s2201_s1 + $0x10] sm:$0xff]  ;;  %852 = vmatpush.msra.mxu0 %v809_v13 }
  0x32   : > { %475 = vrot.lane.b32.xlu0 %v1758_v14, %s1590_s16  ;;  %v502_v16 = vld [vmem:[#allocation2 + $0x10] sm:$0xff]  ;;  %332 = vst.msk [vmem:[#allocation2 + $0x91] sm:$0xff] %vm263_vm0, %v1396_v17  ;;  %v391_v53 = vld [vmem:[#allocation2 + $0x60] sm:$0xff] }
  0x33   : > { %518 = vrot.lane.b32.xlu1 %v502_v16, %s1589_s15  ;;  %v703_v21 = vld [vmem:[#allocation3 + $0x40] sm:$0xff]  ;;  %374 = vst.msk [vmem:[#allocation3 + $0x18] sm:$0xff] %vm263_vm0, %v1405_v22  ;;  %v600_v26 = vld [vmem:[#allocation2 + $0x11] sm:$0xff]  ;;  %v807_v16 = vld [vmem:[%s2201_s1 + $0x8] sm:$0xff]  ;;  %1457 = vmatpush.msra.mxu2 %v808_v15 }
  0x34   : > { %v551_v23 = vld [vmem:[#allocation3 + $0x8] sm:$0xff]  ;;  %333 = vst.msk [vmem:[#allocation2 + $0xa1] sm:$0xff] %vm263_vm0, %v1397_v24  ;;  %853 = vmatpush.msra.mxu0 %v808_v15 }
  0x35   : > { %v653_v18 = vld [vmem:[#allocation2 + $0x80] sm:$0xff]  ;;  %326 = vst.msk [vmem:[#allocation2 + $0x31] sm:$0xff] %vm263_vm0, %v1390_v29  ;;  %1458 = vmatpush.msra.mxu2 %v807_v16 }
  0x36   : > { %v554_v19 = vld [vmem:[#allocation3 + $0x38] sm:$0xff]  ;;  %400 = vst.msk [vmem:[#allocation4 + $0x20] sm:$0xff] %vm263_vm0, %v653_v18  ;;  %v752_v27 = vld [vmem:[#allocation2 + $0x81] sm:$0xff]  ;;  %854 = vmatpush.msra.mxu0 %v807_v16 }
  0x37   : > { %573 = vrot.lane.b32.xlu2 %v554_v19, %s2207_s17  ;;  %v700_v28 = vld [vmem:[#allocation3 + $0x10] sm:$0xff]  ;;  %380 = vst.msk [vmem:[#allocation3 + $0x48] sm:$0xff] %vm263_vm0, %v1411_v30  ;;  %v1402_v17 = vld [vmem:[%s1695_s13 + $0xe1] ss:$2 sm:$0xff] }
  0x38   : > { %v650_v25 = vld [vmem:[#allocation2 + $0x20] sm:$0xff]  ;;  %327 = vst.msk [vmem:[#allocation2 + $0x41] sm:$0xff] %vm263_vm0, %v1391_v32 }
  0x39   : > { %397 = vst.msk [vmem:[#allocation4 + $0x8] sm:$0xff] %vm263_vm0, %v650_v25  ;;  %v506_v33 = vld [vmem:[#allocation2 + $0x90] sm:$0xff]  ;;  %v749_v34 = vld [vmem:[#allocation2 + $0x21] sm:$0xff] }
  0x3a   : > { %622 = vrot.lane.b32.xlu0 %v603_v20, %s1592_s18  ;;  %v604_v35 = vld [vmem:[#allocation2 + $0x91] sm:$0xff]  ;;  %334 = vst.msk [vmem:[#allocation2 + $0xb1] sm:$0xff] %vm263_vm0, %v1398_v36  ;;  %v806_v20 = vld [vmem:[%s2201_s1] sm:$0xff] }
  0x3b   : > { %722 = vrot.lane.b32.xlu1 %v703_v21, %s1593_s19  ;;  %v654_v31 = vld [vmem:[#allocation2 + $0xa0] sm:$0xff]  ;;  %381 = vst.msk [vmem:[#allocation3 + $0x50] sm:$0xff] %vm263_vm0, %v1412_v37  ;;  %v552_v40 = vld [vmem:[#allocation3 + $0x18] sm:$0xff]  ;;  %1459 = vmatpush.msra.mxu2 %v806_v20 }
  0x3c   : > { %401 = vst.msk [vmem:[#allocation4 + $0x28] sm:$0xff] %vm263_vm0, %v654_v31  ;;  %v503_v42 = vld [vmem:[#allocation2 + $0x30] sm:$0xff]  ;;  %v753_v43 = vld [vmem:[#allocation2 + $0xa1] sm:$0xff]  ;;  %855 = vmatpush.msra.mxu0 %v806_v20 }
  0x3d   : > { %382 = vst.msk [vmem:[#allocation3 + $0x58] sm:$0xff] %vm263_vm0, %v1413_v41  ;;  %v601_v48 = vld [vmem:[#allocation2 + $0x31] sm:$0xff] }
  0x3e   : > { %v555_v39 = vld [vmem:[#allocation3 + $0x48] sm:$0xff]  ;;  %328 = vst.msk [vmem:[#allocation2 + $0x51] sm:$0xff] %vm263_vm0, %v1392_v44 }
  0x3f   : > { %672 = vrot.lane.b32.xlu2 %v653_v18, %s1594_s20  ;;  %v651_v38 = vld [vmem:[#allocation2 + $0x40] sm:$0xff]  ;;  %375 = vst.msk [vmem:[#allocation3 + $0x20] sm:$0xff] %vm263_vm0, %v1406_v45 }
  0x40   : > { %398 = vst.msk [vmem:[#allocation4 + $0x10] sm:$0xff] %vm263_vm0, %v651_v38  ;;  %v750_v52 = vld [vmem:[#allocation2 + $0x41] sm:$0xff] }
  0x41   : > { %335 = vst.msk [vmem:[#allocation2 + $0xc1] sm:$0xff] %vm263_vm0, %v1399_v47  ;;  %v507_v55 = vld [vmem:[#allocation2 + $0xb0] sm:$0xff] }
  0x42   : > { %567 = vrot.lane.b32.xlu0 %v551_v23, %s2207_s17  ;;  %v704_v46 = vld [vmem:[#allocation3 + $0x50] sm:$0xff]  ;;  %383 = vst.msk [vmem:[#allocation3 + $0x60] sm:$0xff] %vm263_vm0, %v1414_v49 }
  0x43   : > { %428 = vrot.lane.b32.xlu1 %v703_v21, %s1588_s14  ;;  %396 = vst.msk [vmem:[#allocation4] sm:$0xff] %vm263_vm0, %v388_v50  ;;  %v605_v62 = vld [vmem:[#allocation2 + $0xb1] sm:$0xff] }
  0x44   : > { %399 = vst.msk [vmem:[#allocation4 + $0x18] sm:$0xff] %vm263_vm0, %v391_v53  ;;  %v556_v58 = vld [vmem:[#allocation3 + $0x58] sm:$0xff] }
  0x45   : > { %376 = vst.msk [vmem:[#allocation3 + $0x28] sm:$0xff] %vm263_vm0, %v1407_v56  ;;  %v504_v63 = vld [vmem:[#allocation2 + $0x50] sm:$0xff] }
  0x46   : > { %v701_v54 = vld [vmem:[#allocation3 + $0x20] sm:$0xff]  ;;  %336 = vst.msk [vmem:[#allocation2 + $0xd1] sm:$0xff] %vm263_vm0, %v1400_v57  ;;  %v602_v2 = vld [vmem:[#allocation2 + $0x51] sm:$0xff] }
  0x47   : > { %616 = vrot.lane.b32.xlu2 %v600_v26, %s1592_s18  ;;  %384 = vst.msk [vmem:[#allocation3 + $0x68] sm:$0xff] %vm263_vm0, %v1415_v60  ;;  %v1403_v23 = vld [vmem:[%s1695_s13 + $0xf1] ss:$2 sm:$0xff] }
  0x48   : > { %v655_v51 = vld [vmem:[#allocation2 + $0xc0] sm:$0xff]  ;;  %385 = vst.msk [vmem:[#allocation3 + $0x70] sm:$0xff] %vm263_vm0, %v1416_v5 }
  0x49   : > { %402 = vst.msk [vmem:[#allocation4 + $0x30] sm:$0xff] %vm263_vm0, %v655_v51  ;;  %v705_v8 = vld [vmem:[#allocation3 + $0x60] sm:$0xff] }
  0x4a   : > { %771 = vrot.lane.b32.xlu0 %v752_v27, %s1595_s26  ;;  %337 = vst.msk [vmem:[#allocation2 + $0xe1] sm:$0xff] %vm263_vm0, %v1401_v7  ;;  %v754_v12 = vld [vmem:[#allocation2 + $0xc1] sm:$0xff] }
  0x4b   : > { %716 = vrot.lane.b32.xlu1 %v700_v28, %s1593_s19  ;;  %338 = vst.msk [vmem:[#allocation2 + $0xf1] sm:$0xff] %vm263_vm0, %v1402_v17 }
  0x4c   : > { %v553_v6 = vld [vmem:[#allocation3 + $0x28] sm:$0xff]  ;;  %339 = vst.msk [vmem:[#allocation2 + $0x101] sm:$0xff] %vm263_vm0, %v1403_v23 }
  0x4d   : > { %v508_v18 = vld [vmem:[#allocation2 + $0xd0] sm:$0xff]  ;;  %905 = vst.msk [vmem:[#allocation6] sm:$0xf] %vm904_vm12, %v1587_v0 }
  0x4e   : > { %v606_v24 = vld [vmem:[#allocation2 + $0xd1] sm:$0xff]  ;;  %903 = vst.msk [vmem:[#allocation5] sm:$0x1f] %vm902_vm13, %v1587_v0 }
  0x4f   : > { %666 = vrot.lane.b32.xlu2 %v650_v25, %s1594_s20  ;;  %911 = vst.msk [vmem:[#allocation5] sm:$0x1] %vm910_vm14, %v1587_v0 }
  0x50   : > { %912 = vst.msk [vmem:[#allocation5 + $0x8] sm:$0x1] %vm910_vm14, %v1587_v0 }
  0x51   : > { %v656_v29 = vld [vmem:[#allocation2 + $0xe0] sm:$0xff]  ;;  %913 = vst.msk [vmem:[#allocation5 + $0x10] sm:$0x1] %vm910_vm14, %v1587_v0 }
  0x52   : > { %477 = vrot.lane.b32.xlu0 %v752_v27, %s1590_s16  ;;  %403 = vst.msk [vmem:[#allocation4 + $0x38] sm:$0xff] %vm263_vm0, %v656_v29  ;;  %v607_v45 = vld [vmem:[#allocation2 + $0xf1] sm:$0xff] }
  0x53   : > { %422 = vrot.lane.b32.xlu1 %v700_v28, %s1588_s14  ;;  %v557_v28 = vld [vmem:[#allocation3 + $0x68] sm:$0xff]  ;;  %914 = vst.msk [vmem:[#allocation5 + $0x18] sm:$0x1] %vm910_vm14, %v1587_v0 }
  0x54   : > { %v756_v50 = vld [vmem:[#allocation2 + $0x101] sm:$0xff]  ;;  %915 = vst.msk [vmem:[#allocation5 + $0x20] sm:$0x1] %vm910_vm14, %v1587_v0 }
  0x55   : > { %916 = vst.msk [vmem:[#allocation5 + $0x28] sm:$0x1] %vm910_vm14, %v1587_v0 }
  0x56   : > { %917 = vst.msk [vmem:[#allocation5 + $0x30] sm:$0x1] %vm910_vm14, %v1587_v0 }
  0x57   : > { %526 = vrot.lane.b32.xlu2 %v506_v33, %s1589_s15  ;;  %v706_v33 = vld [vmem:[#allocation3 + $0x70] sm:$0xff]  ;;  %918 = vst.msk [vmem:[#allocation5 + $0x38] sm:$0x1] %vm910_vm14, %v1587_v0 }
  0x58   : > { %919 = vst.msk [vmem:[#allocation5 + $0x40] sm:$0x1] %vm910_vm14, %v1587_v0 }
  0x5a   : > { %765 = vrot.lane.b32.xlu0 %v749_v34, %s1595_s26 }
  0x5b   : > { %624 = vrot.lane.b32.xlu1 %v604_v35, %s1592_s18 }
  0x5f   : > { %575 = vrot.lane.b32.xlu2 %v555_v39, %s2207_s17  ;;  %v1418_v39 = vld [vmem:[%s1695_s13 + $0xf0] ss:$2 sm:$0xff] }
  0x60   : > { %387 = vst.msk [vmem:[#allocation3 + $0x80] sm:$0xff] %vm263_vm0, %v1418_v39 }
  0x62   : > { %471 = vrot.lane.b32.xlu0 %v749_v34, %s1590_s16  ;;  %v1417_v34 = vld [vmem:[%s1695_s13 + $0xe0] ss:$2 sm:$0xff]  ;;  %s1453_s13 = sshll.u32 %s1689_s9, 6  ;;  %s1596_s9 = smov 40  }
  0x63   : > { %569 = vrot.lane.b32.xlu1 %v552_v40, %s2207_s17  ;;  %386 = vst.msk [vmem:[#allocation3 + $0x78] sm:$0xff] %vm263_vm0, %v1417_v34  ;;  %v1024_v34 = vld [vmem:[#allocation5 + $0x1] sm:$0xf]  ;;  %s1991_s28 = scalar_lea.vmem %s2205_s5, %s1453_s13  ;;  %vm1019_vm0 = vcmask 126016  }
  0x67   : > { %520 = vrot.lane.b32.xlu2 %v503_v42, %s1589_s15 }
  0x6a   : > { %674 = vrot.lane.b32.xlu0 %v654_v31, %s1594_s20 }
  0x6b   : > { %773 = vrot.lane.b32.xlu1 %v753_v43, %s1595_s26 }
  0x6f   : > { %724 = vrot.lane.b32.xlu2 %v704_v46, %s1593_s19 }
  0x72   : > { %618 = vrot.lane.b32.xlu0 %v601_v48, %s1592_s18  ;;  %v707_v48 = vld [vmem:[#allocation3 + $0x80] sm:$0xff] }
  0x73   : > { %479 = vrot.lane.b32.xlu1 %v753_v43, %s1590_s16  ;;  %v558_v43 = vld [vmem:[#allocation3 + $0x78] sm:$0xff] }
  0x77   : > { %430 = vrot.lane.b32.xlu2 %v704_v46, %s1588_s14 }
  0x79   : > { %v470_v59 = vpop.permute.xlu2 %469 }
  0x7a   : > { %668 = vrot.lane.b32.xlu0 %v651_v38, %s1594_s20  ;;  %v657_v38 = vld [vmem:[#allocation2 + $0x100] sm:$0xff] }
  0x7b   : > { %767 = vrot.lane.b32.xlu1 %v750_v52, %s1595_s26 }
  0x7f   : > { %718 = vrot.lane.b32.xlu2 %v701_v54, %s1593_s19 }
  0x82   : > { %528 = vrot.lane.b32.xlu0 %v507_v55, %s1589_s15 }
  0x83   : > { %473 = vrot.lane.b32.xlu1 %v750_v52, %s1590_s16 }
  0x87   : > { %424 = vrot.lane.b32.xlu2 %v701_v54, %s1588_s14 }
  0x8a   : > { %577 = vrot.lane.b32.xlu0 %v556_v58, %s2207_s17 }
  0x8b   : > { %676 = vrot.lane.b32.xlu1 %v655_v51, %s1594_s20 }
  0x8e   : > { %v421_v61 = vpop.permute.xlu1 %420 }
  0x8f   : > { %445 = vst.msk [vmem:[#allocation4] sm:$0xff] %vm444_vm3, %v421_v61  ;;  %626 = vrot.lane.b32.xlu2 %v605_v62, %s1592_s18 }
  0x90   : > { %494 = vst.msk [vmem:[#allocation4] sm:$0xff] %vm493_vm2, %v470_v59 }
  0x91   : > { %v574_v3 = vpop.permute.xlu2 %573 }
  0x92   : > { %v427_v1 = vpop.permute.xlu0 %426  ;;  %522 = vrot.lane.b32.xlu0 %v504_v63, %s1589_s15 }
  0x93   : > { %448 = vst.msk [vmem:[#allocation4 + $0x18] sm:$0xff] %vm444_vm3, %v427_v1  ;;  %620 = vrot.lane.b32.xlu1 %v602_v2, %s1592_s18 }
  0x96   : > { %v525_v11 = vpop.permute.xlu1 %524 }
  0x97   : > { %571 = vrot.lane.b32.xlu2 %v553_v6, %s2207_s17  ;;  %s1598_s17 = smov 56  }
  0x99   : > { %v673_v9 = vpop.permute.xlu2 %672 }
  0x9a   : > { %726 = vrot.lane.b32.xlu0 %v705_v8, %s1593_s19 }
  0x9b   : > { %670 = vrot.lane.b32.xlu1 %v391_v53, %s1594_s20 }
  0x9f   : > { %775 = vrot.lane.b32.xlu2 %v754_v12, %s1595_s26 }
  0xa1   : > { %v617_v19 = vpop.permute.xlu2 %616 }
  0xa2   : > { %432 = vrot.lane.b32.xlu0 %v705_v8, %s1588_s14 }
  0xa3   : > { %530 = vrot.lane.b32.xlu1 %v508_v18, %s1589_s15 }
  0xa4   : > { %v476_v21 = vpop.permute.xlu0 %475 }
  0xa5   : > { %497 = vst.msk [vmem:[#allocation4 + $0x18] sm:$0xff] %vm493_vm2, %v476_v21  ;;  %v519_v22 = vpop.permute.xlu1 %518 }
  0xa6   : > { %546 = vst.msk [vmem:[#allocation4 + $0x18] sm:$0xff] %vm542_vm5, %v525_v11 }
  0xa7   : > { %595 = vst.msk [vmem:[#allocation4 + $0x18] sm:$0xff] %vm591_vm6, %v574_v3  ;;  %481 = vrot.lane.b32.xlu2 %v754_v12, %s1590_s16 }
  0xa8   : > { %543 = vst.msk [vmem:[#allocation4] sm:$0xff] %vm542_vm5, %v519_v22 }
  0xa9   : > { %v667_v25 = vpop.permute.xlu2 %666 }
  0xaa   : > { %720 = vrot.lane.b32.xlu0 %v1712_v4, %s1593_s19  ;;  %v755_v4 = vld [vmem:[#allocation2 + $0xe1] sm:$0xff] }
  0xab   : > { %628 = vrot.lane.b32.xlu1 %v606_v24, %s1592_s18 }
  0xac   : > { %v623_v26 = vpop.permute.xlu0 %622 }
  0xad   : > { %644 = vst.msk [vmem:[#allocation4 + $0x18] sm:$0xff] %vm640_vm7, %v623_v26  ;;  %v723_v27 = vpop.permute.xlu1 %722 }
  0xae   : > { %694 = vst.msk [vmem:[#allocation4 + $0x18] sm:$0xff] %vm690_vm8, %v673_v9 }
  0xaf   : > { %744 = vst.msk [vmem:[#allocation4 + $0x18] sm:$0xff] %vm740_vm9, %v723_v27  ;;  %769 = vrot.lane.b32.xlu2 %v1758_v14, %s1595_s26  ;;  %v509_v14 = vld [vmem:[#allocation2 + $0xf0] sm:$0xff] }
  0xb1   : > { %v527_v30 = vpop.permute.xlu2 %526 }
  0xb2   : > { %579 = vrot.lane.b32.xlu0 %v557_v28, %s2211_s11 }
  0xb3   : > { %777 = vrot.lane.b32.xlu1 %v755_v4, %s1595_s26 }
  0xb4   : > { %v568_v31 = vpop.permute.xlu0 %567 }
  0xb5   : > { %592 = vst.msk [vmem:[#allocation4] sm:$0xff] %vm591_vm6, %v568_v31  ;;  %v429_v32 = vpop.permute.xlu1 %428 }
  0xb6   : > { %641 = vst.msk [vmem:[#allocation4] sm:$0xff] %vm640_vm7, %v617_v19 }
  0xb7   : > { %449 = vst.msk [vmem:[#allocation4 + $0x20] sm:$0xff] %vm444_vm3, %v429_v32  ;;  %678 = vrot.lane.b32.xlu2 %v656_v29, %s1594_s20 }
  0xb8   : > { %691 = vst.msk [vmem:[#allocation4] sm:$0xff] %vm690_vm8, %v667_v25 }
  0xb9   : > { %v576_v35 = vpop.permute.xlu2 %575 }
  0xba   : > { %728 = vrot.lane.b32.xlu0 %v706_v33, %s1593_s19 }
  0xbb   : > { %532 = vrot.lane.b32.xlu1 %v509_v14, %s1589_s15  ;;  %v999_v14 = vld [vmem:[#allocation6] sm:$0xf]  ;;  %s250_s15 = sand.u32 1, %s1577_s22  }
  0xbc   : > { %v772_v36 = vpop.permute.xlu0 %771 }
  0xbd   : > { %793 = vst.msk [vmem:[#allocation4 + $0x18] sm:$0xff] %vm789_vm10, %v772_v36  ;;  %v717_v37 = vpop.permute.xlu1 %716  ;;  %v1982_v36 = vld [vmem:[%s2202_s2] ss:$0 sm:$0xff] }
  0xbe   : > { %741 = vst.msk [vmem:[#allocation4] sm:$0xff] %vm740_vm9, %v717_v37 }
  0xbf   : > { %434 = vrot.lane.b32.xlu2 %v706_v33, %s1588_s14 }
  0xc1   : > { %v521_v40 = vpop.permute.xlu2 %520 }
  0xc2   : > { %483 = vrot.lane.b32.xlu0 %v755_v4, %s1590_s16 }
  0xc3   : > { %680 = vrot.lane.b32.xlu1 %v657_v38, %s1594_s20 }
  0xc4   : > { %v478_v41 = vpop.permute.xlu0 %477  ;;  %v801_v42 = vld [vmem:[#allocation4 + $0x18] sm:$0xff] }
  0xc5   : > { %498 = vst.msk [vmem:[#allocation4 + $0x20] sm:$0xff] %vm493_vm2, %v478_v41  ;;  %1423 = vmatmul.msk.f32.vlgmr.msra.gmra.mxu2 %vm811_vm11, %v801_v42  ;;  %v423_v44 = vpop.permute.xlu1 %422 }
  0xc6   : > { %547 = vst.msk [vmem:[#allocation4 + $0x20] sm:$0xff] %vm542_vm5, %v527_v30 }
  0xc7   : > { %446 = vst.msk [vmem:[#allocation4 + $0x8] sm:$0xff] %vm444_vm3, %v423_v44  ;;  %581 = vrot.lane.b32.xlu2 %v558_v43, %s2211_s11 }
  0xc8   : > { %596 = vst.msk [vmem:[#allocation4 + $0x20] sm:$0xff] %vm591_vm6, %v576_v35 }
  0xc9   : > { %v725_v46 = vpop.permute.xlu2 %724 }
  0xca   : > { %630 = vrot.lane.b32.xlu0 %v607_v45, %s1592_s18  ;;  %s1383_s18 = sshll.u32 %s250_s15, 4 }
  0xcb   : > { %1032 = vrot.lane.b32.xlu1 %v1024_v34, %s2211_s11 }
  0xcc   : > { %v766_v47 = vpop.permute.xlu0 %765 }
  0xcd   : > { %790 = vst.msk [vmem:[#allocation4] sm:$0xff] %vm789_vm10, %v766_v47  ;;  %v625_v49 = vpop.permute.xlu1 %624 }
  0xce   : > { %645 = vst.msk [vmem:[#allocation4 + $0x20] sm:$0xff] %vm640_vm7, %v625_v49 }
  0xcf   : > { %730 = vrot.lane.b32.xlu2 %v707_v48, %s1593_s19 }
  0xd1   : > { %v431_v51 = vpop.permute.xlu2 %430 }
  0xd2   : > { %779 = vrot.lane.b32.xlu0 %v756_v50, %s1595_s26  ;;  %450 = vst.msk [vmem:[#allocation4 + $0x28] sm:$0xff] %vm444_vm3, %v431_v51 }
  0xd4   : > { %v472_v52 = vpop.permute.xlu0 %471  ;;  %v798_v53 = vld [vmem:[#allocation4] sm:$0xff] }
  0xd5   : > { %495 = vst.msk [vmem:[#allocation4 + $0x8] sm:$0xff] %vm493_vm2, %v472_v52  ;;  %1420 = vmatmul.msk.f32.vlgmr.msra.gmra.mxu0 %vm811_vm11, %v798_v53  ;;  %v570_v54 = vpop.permute.xlu1 %569 }
  0xd6   : > { %544 = vst.msk [vmem:[#allocation4 + $0x8] sm:$0xff] %vm542_vm5, %v521_v40 }
  0xd7   : > { %593 = vst.msk [vmem:[#allocation4 + $0x8] sm:$0xff] %vm591_vm6, %v570_v54  ;;  %1007 = vrot.lane.b32.xlu2 %v999_v14, %s1590_s16 }
  0xd9   : > { %v719_v55 = vpop.permute.xlu2 %718 }
  0xdc   : > { %v675_v56 = vpop.permute.xlu0 %674 }
  0xdd   : > { %695 = vst.msk [vmem:[#allocation4 + $0x20] sm:$0xff] %vm690_vm8, %v675_v56  ;;  %v774_v57 = vpop.permute.xlu1 %773 }
  0xde   : > { %745 = vst.msk [vmem:[#allocation4 + $0x20] sm:$0xff] %vm740_vm9, %v725_v46 }
  0xdf   : > { %794 = vst.msk [vmem:[#allocation4 + $0x20] sm:$0xff] %vm789_vm10, %v774_v57 }
  0xe1   : > { %v425_v58 = vpop.permute.xlu2 %424 }
  0xe2   : > { %447 = vst.msk [vmem:[#allocation4 + $0x10] sm:$0xff] %vm444_vm3, %v425_v58 }
  0xe4   : > { %v619_v59 = vpop.permute.xlu0 %618 }
  0xe5   : > { %642 = vst.msk [vmem:[#allocation4 + $0x8] sm:$0xff] %vm640_vm7, %v619_v59  ;;  %v480_v60 = vpop.permute.xlu1 %479 }
  0xe6   : > { %499 = vst.msk [vmem:[#allocation4 + $0x28] sm:$0xff] %vm493_vm2, %v480_v60  ;;  %v802_v61 = vld [vmem:[#allocation4 + $0x20] sm:$0xff] }
  0xe7   : > { %1424 = vmatmul.msk.f32.gmra.mxu2 %vm811_vm11, %v802_v61 }
  0xe9   : > { %v627_v62 = vpop.permute.xlu2 %626 }
  0xec   : > { %v669_v63 = vpop.permute.xlu0 %668 }
  0xed   : > { %692 = vst.msk [vmem:[#allocation4 + $0x8] sm:$0xff] %vm690_vm8, %v669_v63  ;;  %v768_v1 = vpop.permute.xlu1 %767 }
  0xee   : > { %742 = vst.msk [vmem:[#allocation4 + $0x8] sm:$0xff] %vm740_vm9, %v719_v55 }
  0xef   : > { %791 = vst.msk [vmem:[#allocation4 + $0x8] sm:$0xff] %vm789_vm10, %v768_v1 }
  0xf1   : > { %v572_v2 = vpop.permute.xlu2 %571 }
  0xf4   : > { %v529_v3 = vpop.permute.xlu0 %528 }
  0xf5   : > { %548 = vst.msk [vmem:[#allocation4 + $0x28] sm:$0xff] %vm542_vm5, %v529_v3  ;;  %v474_v5 = vpop.permute.xlu1 %473 }
  0xf6   : > { %v799_v6 = vld [vmem:[#allocation4 + $0x8] sm:$0xff]  ;;  %496 = vst.msk [vmem:[#allocation4 + $0x10] sm:$0xff] %vm493_vm2, %v474_v5 }
  0xf7   : > { %1421 = vmatmul.msk.f32.gmra.mxu0 %vm811_vm11, %v799_v6 }
  0xf9   : > { %v776_v7 = vpop.permute.xlu2 %775 }
  0xfc   : > { %v578_v8 = vpop.permute.xlu0 %577 }
  0xfd   : > { %597 = vst.msk [vmem:[#allocation4 + $0x28] sm:$0xff] %vm591_vm6, %v578_v8  ;;  %v677_v9 = vpop.permute.xlu1 %676 }
  0xfe   : > { %646 = vst.msk [vmem:[#allocation4 + $0x28] sm:$0xff] %vm640_vm7, %v627_v62 }
  0xff   : > { %696 = vst.msk [vmem:[#allocation4 + $0x28] sm:$0xff] %vm690_vm8, %v677_v9 }
 0x101   : > { %v482_v10 = vpop.permute.xlu2 %481 }
 0x104   : > { %v523_v11 = vpop.permute.xlu0 %522 }
 0x105   : > { %545 = vst.msk [vmem:[#allocation4 + $0x10] sm:$0xff] %vm542_vm5, %v523_v11  ;;  %v621_v12 = vpop.permute.xlu1 %620 }
 0x106   : > { %594 = vst.msk [vmem:[#allocation4 + $0x10] sm:$0xff] %vm591_vm6, %v572_v2 }
 0x107   : > { %643 = vst.msk [vmem:[#allocation4 + $0x10] sm:$0xff] %vm640_vm7, %v621_v12 }
 0x109   : > { %v770_v13 = vpop.permute.xlu2 %769 }
 0x10c   : > { %v727_v15 = vpop.permute.xlu0 %726 }
 0x10d   : > { %746 = vst.msk [vmem:[#allocation4 + $0x28] sm:$0xff] %vm740_vm9, %v727_v15  ;;  %v671_v16 = vpop.permute.xlu1 %670 }
 0x10e   : > { %795 = vst.msk [vmem:[#allocation4 + $0x28] sm:$0xff] %vm789_vm10, %v776_v7 }
 0x10f   : > { %693 = vst.msk [vmem:[#allocation4 + $0x10] sm:$0xff] %vm690_vm8, %v671_v16 }
 0x111   : > { %v679_v17 = vpop.permute.xlu2 %678 }
 0x114   : > { %v433_v18 = vpop.permute.xlu0 %432 }
 0x115   : > { %451 = vst.msk [vmem:[#allocation4 + $0x30] sm:$0xff] %vm444_vm3, %v433_v18  ;;  %v803_v19 = vld [vmem:[#allocation4 + $0x28] sm:$0xff]  ;;  %v531_v20 = vpop.permute.xlu1 %530 }
 0x116   : > { %500 = vst.msk [vmem:[#allocation4 + $0x30] sm:$0xff] %vm493_vm2, %v482_v10  ;;  %1425 = vmatmul.msk.f32.gmra.mxu2 %vm811_vm11, %v803_v19 }
 0x117   : > { %549 = vst.msk [vmem:[#allocation4 + $0x30] sm:$0xff] %vm542_vm5, %v531_v20 }
 0x119   : > { %v435_v21 = vpop.permute.xlu2 %434 }
 0x11a   : > { %452 = vst.msk [vmem:[#allocation4 + $0x38] sm:$0xff] %vm444_vm3, %v435_v21  ;;  %vm1094_vm3 = vcmask 322816  }
 0x11c   : > { %v721_v22 = vpop.permute.xlu0 %720 }
 0x11d   : > { %743 = vst.msk [vmem:[#allocation4 + $0x10] sm:$0xff] %vm740_vm9, %v721_v22  ;;  %v629_v23 = vpop.permute.xlu1 %628 }
 0x11e   : > { %792 = vst.msk [vmem:[#allocation4 + $0x10] sm:$0xff] %vm789_vm10, %v770_v13  ;;  %v991_v13 = vld [vmem:[#allocation5] sm:$0xf] }
 0x11f   : > { %995 = vst.msk [vmem:[#allocation7] sm:$0xf] %vm904_vm12, %v991_v13 }
 0x121   : > { %v582_v29 = vpop.permute.xlu2 %581 }
 0x124   : > { %v580_v24 = vpop.permute.xlu0 %579 }
 0x125   : > { %598 = vst.msk [vmem:[#allocation4 + $0x30] sm:$0xff] %vm591_vm6, %v580_v24  ;;  %v800_v25 = vld [vmem:[#allocation4 + $0x10] sm:$0xff]  ;;  %v778_v26 = vpop.permute.xlu1 %777 }
 0x126   : > { %1422 = vmatmul.msk.f32.gmra.mxu0 %vm811_vm11, %v800_v25  ;;  %647 = vst.msk [vmem:[#allocation4 + $0x30] sm:$0xff] %vm640_vm7, %v629_v23 }
 0x127   : > { %697 = vst.msk [vmem:[#allocation4 + $0x30] sm:$0xff] %vm690_vm8, %v679_v17 }
 0x129   : > { %v731_v33 = vpop.permute.xlu2 %730 }
 0x12c   : > { %v729_v27 = vpop.permute.xlu0 %728 }
 0x12d   : > { %747 = vst.msk [vmem:[#allocation4 + $0x30] sm:$0xff] %vm740_vm9, %v729_v27  ;;  %v533_v28 = vpop.permute.xlu1 %532 }
 0x12e   : > { %796 = vst.msk [vmem:[#allocation4 + $0x30] sm:$0xff] %vm789_vm10, %v778_v26 }
 0x131   : > { %v1008_v16 = vpop.permute.xlu2 %1007 }
 0x132   : > { %1020 = vst.msk [vmem:[#allocation7] sm:$0xf] %vm1019_vm0, %v1008_v16  ;;  %v1206_v16 = vld [vmem:[%s2203_s3 + $0x8] sm:$0xff] }
 0x134   : > { %v484_v4 = vpop.permute.xlu0 %483 }
 0x135   : > { %501 = vst.msk [vmem:[#allocation4 + $0x38] sm:$0xff] %vm493_vm2, %v484_v4  ;;  %v804_v30 = vld [vmem:[#allocation4 + $0x30] sm:$0xff]  ;;  %v681_v31 = vpop.permute.xlu1 %680  ;;  %vm1069_vm2 = vcmask 257216  }
 0x136   : > { %1426 = vmatmul.msk.f32.gmra.mxu2 %vm811_vm11, %v804_v30  ;;  %550 = vst.msk [vmem:[#allocation4 + $0x38] sm:$0xff] %vm542_vm5, %v533_v28  ;;  %vm986_vm5 = vcmask 584704  }
 0x137   : > { %599 = vst.msk [vmem:[#allocation4 + $0x38] sm:$0xff] %vm591_vm6, %v582_v29  ;;  %vm1145_vm6 = vcmask 454016  }
 0x138   : > { %988 = vst.msk [vmem:[#allocation7 + $0xc] sm:$0xf] %vm986_vm5, %v1587_v0 }
 0x139   : > { %987 = vst.msk [vmem:[#allocation7 + $0x4] sm:$0xf] %vm986_vm5, %v1587_v0 }
 0x13a   : > { %989 = vst.msk [vmem:[#allocation7 + $0x14] sm:$0xf] %vm986_vm5, %v1587_v0 }
 0x13b   : > { %990 = vst.msk [vmem:[#allocation7 + $0x1c] sm:$0xf] %vm986_vm5, %v1587_v0 }
 0x13c   : > { %v631_v32 = vpop.permute.xlu0 %630 }
 0x13d   : > { %648 = vst.msk [vmem:[#allocation4 + $0x38] sm:$0xff] %vm640_vm7, %v631_v32  ;;  %v1033_v28 = vpop.permute.xlu1 %1032  ;;  %vm1171_vm7 = vcmask 519616  }
 0x13e   : > { %698 = vst.msk [vmem:[#allocation4 + $0x38] sm:$0xff] %vm690_vm8, %v681_v31  ;;  %vm1196_vm8 = vcmask 585216  }
 0x13f   : > { %748 = vst.msk [vmem:[#allocation4 + $0x38] sm:$0xff] %vm740_vm9, %v731_v33  ;;  %vm1214_vm9 = vcmask 588800  }
 0x140   : > { %1045 = vst.msk [vmem:[#allocation7] sm:$0xf] %vm1044_vm1, %v1033_v28 }
 0x144   : > { %v780_v35 = vpop.permute.xlu0 %779 }
 0x145   : > { %797 = vst.msk [vmem:[#allocation4 + $0x38] sm:$0xff] %vm789_vm10, %v780_v35 }
 0x148   : > { %v866_v37 = vpop.f32.mrf.mxu2 }
 0x149   : > { %v888_v38 = vadd.f32 %v1982_v36, %v866_v37 }
 0x14b   : > { %897 = vst.msk [vmem:[%s1991_s28 + $0x18] sm:$0xff] %vm893_vm15, %v888_v38 }
 0x14c   : > { %v805_v39 = vld [vmem:[#allocation4 + $0x38] sm:$0xff] }
 0x14d   : > { %1427 = vmatmul.msk.f32.gmra.mxu2 %vm811_vm11, %v805_v39 }
 0x152   : > { %v857_v40 = vpop.f32.mrf.mxu0  ;;  %v1431_v41 = vld [vmem:[%s1991_s28 + $0x19] ss:$2 sm:$0xf]  ;;  %v1438_v42 = vld [vmem:[%s1991_s28 + $0x18] ss:$2 sm:$0xf] }
 0x153   : > { %v885_v43 = vadd.f32 %v1982_v36, %v857_v40  ;;  %v940_v44 = vmax.f32 %v1431_v41, 0.0  ;;  %v972_v45 = vmax.f32 %v1438_v42, 0.0 }
 0x155   : > { %894 = vst.msk [vmem:[%s1991_s28] sm:$0xff] %vm893_vm15, %v885_v43 }
 0x156   : > { %949 = vst.msk [vmem:[#allocation5 + $0x21] sm:$0xf] %vm904_vm12, %v940_v44 }
 0x157   : > { %981 = vst.msk [vmem:[#allocation6 + $0x10] sm:$0xf] %vm904_vm12, %v972_v45 }
 0x15c   : > { %v954_v46 = vld [vmem:[%s1991_s28] ss:$2 sm:$0xf]  ;;  %v1428_v47 = vld [vmem:[%s1991_s28 + $0x1] ss:$2 sm:$0xf] }
 0x15d   : > { %v969_v48 = vmax.f32 %v954_v46, 0.0  ;;  %v937_v49 = vmax.f32 %v1428_v47, 0.0  ;;  %v993_v50 = vld [vmem:[#allocation5 + $0x20] sm:$0xf] }
 0x15e   : > { %997 = vst.msk [vmem:[#allocation7 + $0x10] sm:$0xf] %vm904_vm12, %v993_v50  ;;  %v1126_v56 = vld [vmem:[#allocation5 + $0x20] sm:$0xf] }
 0x15f   : > { %978 = vst.msk [vmem:[#allocation6 + $0x4] sm:$0xf] %vm904_vm12, %v969_v48  ;;  %v1001_v63 = vld [vmem:[#allocation6 + $0x10] sm:$0xf] }
 0x160   : > { %946 = vst.msk [vmem:[#allocation5 + $0x9] sm:$0xf] %vm904_vm12, %v937_v49  ;;  %v1152_v9 = vld [vmem:[#allocation6 + $0x10] sm:$0xf] }
 0x161   : > { %v1177_v10 = vld [vmem:[#allocation5 + $0x21] sm:$0xf] }
 0x162   : > { %v1026_v11 = vld [vmem:[#allocation5 + $0x21] sm:$0xf] }
 0x166   : > { %v1074_v51 = vld [vmem:[#allocation6 + $0x4] sm:$0xf] }
 0x167   : > { %1082 = vrot.lane.b32.xlu1 %v1074_v51, %s1595_s26  ;;  %v1099_v52 = vld [vmem:[#allocation5 + $0x9] sm:$0xf] }
 0x168   : > { %v1049_v53 = vld [vmem:[#allocation5 + $0x8] sm:$0xf]  ;;  %1107 = vrot.lane.b32.xlu2 %v1099_v52, %s1596_s9 }
 0x169   : > { %1057 = vrot.lane.b32.xlu0 %v1049_v53, %s1594_s20 }
 0x16a   : > { %v869_v54 = vpop.f32.mrf.mxu2 }
 0x16b   : > { %v889_v55 = vadd.f32 %v1982_v36, %v869_v54 }
 0x16d   : > { %898 = vst.msk [vmem:[%s1991_s28 + $0x20] sm:$0xff] %vm893_vm15, %v889_v55 }
 0x171   : > { %1135 = vrot.lane.b32.xlu0 %v1126_v56, %s1597_s29 }
 0x174   : > { %v860_v57 = vpop.f32.mrf.mxu0  ;;  %v1432_v58 = vld [vmem:[%s1991_s28 + $0x21] ss:$2 sm:$0xf]  ;;  %v1439_v59 = vld [vmem:[%s1991_s28 + $0x20] ss:$2 sm:$0xf] }
 0x175   : > { %v886_v60 = vadd.f32 %v1982_v36, %v860_v57  ;;  %v941_v61 = vmax.f32 %v1432_v58, 0.0  ;;  %v973_v62 = vmax.f32 %v1439_v59, 0.0 }
 0x177   : > { %895 = vst.msk [vmem:[%s1991_s28 + $0x8] sm:$0xff] %vm893_vm15, %v886_v60 }
 0x178   : > { %950 = vst.msk [vmem:[#allocation5 + $0x29] sm:$0xf] %vm904_vm12, %v941_v61 }
 0x179   : > { %1011 = vrot.lane.b32.xlu0 %v1001_v63, %s1590_s16  ;;  %982 = vst.msk [vmem:[#allocation6 + $0x14] sm:$0xf] %vm904_vm12, %v973_v62 }
 0x17e   : > { %v1436_v1 = vld [vmem:[%s1991_s28 + $0x8] ss:$2 sm:$0xf]  ;;  %v1429_v2 = vld [vmem:[%s1991_s28 + $0x9] ss:$2 sm:$0xf] }
 0x17f   : > { %v970_v3 = vmax.f32 %v1436_v1, 0.0  ;;  %v938_v5 = vmax.f32 %v1429_v2, 0.0  ;;  %v1101_v33 = vld [vmem:[#allocation5 + $0x29] sm:$0xf] }
 0x180   : > { %v1051_v14 = vld [vmem:[#allocation5 + $0x28] sm:$0xf]  ;;  %v1076_v34 = vld [vmem:[#allocation6 + $0x14] sm:$0xf] }
 0x181   : > { %979 = vst.msk [vmem:[#allocation6 + $0x8] sm:$0xf] %vm904_vm12, %v970_v3 }
 0x182   : > { %947 = vst.msk [vmem:[#allocation5 + $0x11] sm:$0xf] %vm904_vm12, %v938_v5  ;;  %v1213_v5 = vld [vmem:[%s2203_s3 + $0x40] sm:$0xff] }
 0x183   : > { %1460 = vmatpush.msra.mxu3 %v1213_v5  ;;  %1234 = vmatpush.msra.mxu1 %v1213_v5 }
 0x188   : > { %v1000_v6 = vld [vmem:[#allocation6 + $0x8] sm:$0xf] }
 0x189   : > { %1009 = vrot.lane.b32.xlu1 %v1000_v6, %s1590_s16  ;;  %v1025_v7 = vld [vmem:[#allocation5 + $0x11] sm:$0xf]  ;;  %v1151_v63 = vld [vmem:[#allocation6 + $0x8] sm:$0xf]  ;;  %v1212_v6 = vld [vmem:[%s2203_s3 + $0x38] sm:$0xff] }
 0x18a   : > { %1034 = vrot.lane.b32.xlu2 %v1025_v7, %s2211_s11  ;;  %v992_v8 = vld [vmem:[#allocation5 + $0x10] sm:$0xf]  ;;  %1461 = vmatpush.msra.mxu3 %v1212_v6 }
 0x18b   : > { %996 = vst.msk [vmem:[#allocation7 + $0x8] sm:$0xf] %vm904_vm12, %v992_v8  ;;  %v1125_v61 = vld [vmem:[#allocation5 + $0x10] sm:$0xf]  ;;  %1235 = vmatpush.msra.mxu1 %v1212_v6 }
 0x18c   : > { %v1176_v62 = vld [vmem:[#allocation5 + $0x11] sm:$0xf] }
 0x191   : > { %1161 = vrot.lane.b32.xlu1 %v1152_v9, %s1598_s17  ;;  %v1211_v9 = vld [vmem:[%s2203_s3 + $0x30] sm:$0xff] }
 0x192   : > { %1186 = vrot.lane.b32.xlu2 %v1177_v10, %s1599_s10  ;;  %1462 = vmatpush.msra.mxu3 %v1211_v9  ;;  %v1210_v10 = vld [vmem:[%s2203_s3 + $0x28] sm:$0xff] }
 0x193   : > { %1236 = vmatpush.msra.mxu1 %v1211_v9 }
 0x194   : > { %1463 = vmatpush.msra.mxu3 %v1210_v10 }
 0x195   : > { %1237 = vmatpush.msra.mxu1 %v1210_v10 }
 0x199   : > { %1036 = vrot.lane.b32.xlu1 %v1026_v11, %s2211_s11  ;;  %v872_v12 = vpop.f32.mrf.mxu2  ;;  %v1209_v11 = vld [vmem:[%s2203_s3 + $0x20] sm:$0xff] }
 0x19a   : > { %v890_v15 = vadd.f32 %v1982_v36, %v872_v12  ;;  %v1208_v12 = vld [vmem:[%s2203_s3 + $0x18] sm:$0xff]  ;;  %1464 = vmatpush.msra.mxu3 %v1209_v11  ;;  %1238 = vmatpush.msra.mxu1 %v1209_v11 }
 0x19c   : > { %899 = vst.msk [vmem:[%s1991_s28 + $0x28] sm:$0xff] %vm893_vm15, %v890_v15  ;;  %1465 = vmatpush.msra.mxu3 %v1208_v12  ;;  %1239 = vmatpush.msra.mxu1 %v1208_v12  ;;  %v1207_v15 = vld [vmem:[%s2203_s3 + $0x10] sm:$0xff] }
 0x19e   : > { %1466 = vmatpush.msra.mxu3 %v1207_v15  ;;  %1240 = vmatpush.msra.mxu1 %v1207_v15 }
 0x1a0   : > { %1467 = vmatpush.msra.mxu3 %v1206_v16  ;;  %1241 = vmatpush.msra.mxu1 %v1206_v16 }
 0x1a3   : > { %v863_v17 = vpop.f32.mrf.mxu0  ;;  %v1433_v18 = vld [vmem:[%s1991_s28 + $0x29] ss:$2 sm:$0xf]  ;;  %v1440_v19 = vld [vmem:[%s1991_s28 + $0x28] ss:$2 sm:$0xf] }
 0x1a4   : > { %v887_v20 = vadd.f32 %v1982_v36, %v863_v17  ;;  %v942_v21 = vmax.f32 %v1433_v18, 0.0  ;;  %v974_v22 = vmax.f32 %v1440_v19, 0.0  ;;  %v1205_v17 = vld [vmem:[%s2203_s3] sm:$0xff] }
 0x1a5   : > { %1468 = vmatpush.msra.mxu3 %v1205_v17  ;;  %1242 = vmatpush.msra.mxu1 %v1205_v17 }
 0x1a6   : > { %896 = vst.msk [vmem:[%s1991_s28 + $0x10] sm:$0xff] %vm893_vm15, %v887_v20 }
 0x1a7   : > { %951 = vst.msk [vmem:[#allocation5 + $0x31] sm:$0xf] %vm904_vm12, %v942_v21 }
 0x1a8   : > { %983 = vst.msk [vmem:[#allocation6 + $0x18] sm:$0xf] %vm904_vm12, %v974_v22 }
 0x1ad   : > { %v1437_v23 = vld [vmem:[%s1991_s28 + $0x10] ss:$2 sm:$0xf]  ;;  %v1430_v24 = vld [vmem:[%s1991_s28 + $0x11] ss:$2 sm:$0xf] }
 0x1ae   : > { %v971_v25 = vmax.f32 %v1437_v23, 0.0  ;;  %v939_v26 = vmax.f32 %v1430_v24, 0.0  ;;  %v994_v27 = vld [vmem:[#allocation5 + $0x30] sm:$0xf] }
 0x1af   : > { %998 = vst.msk [vmem:[#allocation7 + $0x18] sm:$0xf] %vm904_vm12, %v994_v27  ;;  %v1178_v40 = vld [vmem:[#allocation5 + $0x31] sm:$0xf]  ;;  %v1153_v42 = vld [vmem:[#allocation6 + $0x18] sm:$0xf] }
 0x1b0   : > { %980 = vst.msk [vmem:[#allocation6 + $0xc] sm:$0xf] %vm904_vm12, %v971_v25  ;;  %v1127_v41 = vld [vmem:[#allocation5 + $0x30] sm:$0xf]  ;;  %v1002_v44 = vld [vmem:[#allocation6 + $0x18] sm:$0xf] }
 0x1b1   : > { %948 = vst.msk [vmem:[#allocation5 + $0x19] sm:$0xf] %vm904_vm12, %v939_v26  ;;  %v1027_v45 = vld [vmem:[#allocation5 + $0x31] sm:$0xf] }
 0x1b7   : > { %v1075_v29 = vld [vmem:[#allocation6 + $0xc] sm:$0xf] }
 0x1b8   : > { %1084 = vrot.lane.b32.xlu1 %v1075_v29, %s1595_s26  ;;  %v1100_v4 = vld [vmem:[#allocation5 + $0x19] sm:$0xf] }
 0x1b9   : > { %v1050_v30 = vld [vmem:[#allocation5 + $0x18] sm:$0xf]  ;;  %1109 = vrot.lane.b32.xlu2 %v1100_v4, %s1596_s9  ;;  %v875_v31 = vpop.f32.mrf.mxu2 }
 0x1ba   : > { %1059 = vrot.lane.b32.xlu0 %v1050_v30, %s1594_s20  ;;  %v891_v32 = vadd.f32 %v1982_v36, %v875_v31 }
 0x1bc   : > { %900 = vst.msk [vmem:[%s1991_s28 + $0x30] sm:$0xff] %vm893_vm15, %v891_v32 }
 0x1c0   : > { %1111 = vrot.lane.b32.xlu1 %v1101_v33, %s1596_s9 }
 0x1c1   : > { %1061 = vrot.lane.b32.xlu2 %v1051_v14, %s1594_s20 }
 0x1c2   : > { %1086 = vrot.lane.b32.xlu0 %v1076_v34, %s1595_s26 }
 0x1c3   : > { %v1434_v35 = vld [vmem:[%s1991_s28 + $0x31] ss:$2 sm:$0xf]  ;;  %v1441_v37 = vld [vmem:[%s1991_s28 + $0x30] ss:$2 sm:$0xf] }
 0x1c4   : > { %v943_v38 = vmax.f32 %v1434_v35, 0.0  ;;  %v975_v39 = vmax.f32 %v1441_v37, 0.0 }
 0x1c6   : > { %952 = vst.msk [vmem:[#allocation5 + $0x39] sm:$0xf] %vm904_vm12, %v943_v38 }
 0x1c7   : > { %984 = vst.msk [vmem:[#allocation6 + $0x1c] sm:$0xf] %vm904_vm12, %v975_v39  ;;  %v1522_v39 = vld [vmem:[%s2204_s4] ss:$0 sm:$0xff] }
 0x1c8   : > { %1188 = vrot.lane.b32.xlu1 %v1178_v40, %s1599_s10 }
 0x1c9   : > { %1137 = vrot.lane.b32.xlu2 %v1127_v41, %s1597_s29 }
 0x1ca   : > { %1163 = vrot.lane.b32.xlu0 %v1153_v42, %s1598_s17 }
 0x1cd   : > { %v1052_v43 = vld [vmem:[#allocation5 + $0x38] sm:$0xf] }
 0x1ce   : > { %v1077_v48 = vld [vmem:[#allocation6 + $0x1c] sm:$0xf]  ;;  %v1102_v49 = vld [vmem:[#allocation5 + $0x39] sm:$0xf] }
 0x1d0   : > { %v878_v46 = vpop.f32.mrf.mxu2  ;;  %1063 = vrot.lane.b32.xlu1 %v1052_v43, %s1594_s20 }
 0x1d1   : > { %1013 = vrot.lane.b32.xlu2 %v1002_v44, %s1590_s16  ;;  %v892_v47 = vadd.f32 %v1982_v36, %v878_v46  ;;  %v1108_v36 = vpop.permute.xlu2 %1107 }
 0x1d2   : > { %1038 = vrot.lane.b32.xlu0 %v1027_v45, %s2211_s11  ;;  %s1274_s11 = scalar_lea.sflag [#allocation9], %s250_s15 }
 0x1d3   : > { %901 = vst.msk [vmem:[%s1991_s28 + $0x38] sm:$0xff] %vm893_vm15, %v892_v47 }
 0x1d9   : > { %1088 = vrot.lane.b32.xlu2 %v1077_v48, %s1595_s26  ;;  %v1083_v50 = vpop.permute.xlu1 %1082 }
 0x1da   : > { %1113 = vrot.lane.b32.xlu0 %v1102_v49, %s1596_s9  ;;  %v1442_v52 = vld [vmem:[%s1991_s28 + $0x38] ss:$2 sm:$0xf]  ;;  %v1435_v53 = vld [vmem:[%s1991_s28 + $0x39] ss:$2 sm:$0xf] }
 0x1db   : > { %v1058_v51 = vpop.permute.xlu0 %1057  ;;  %v976_v54 = vmax.f32 %v1442_v52, 0.0  ;;  %v944_v55 = vmax.f32 %v1435_v53, 0.0  ;;  %s252_s28 = scalar_lea.vmem [#allocation8], %s1383_s18  ;;  %s1454_s9 = sshll.u32 %s1656_s25, 4 }
 0x1dc   : > { %1070 = vst.msk [vmem:[#allocation7] sm:$0xf] %vm1069_vm2, %v1058_v51  ;;  %s1288_s16 = scalar_lea.hbm %s2206_s6, %s1454_s9  ;;  %s1289_s20 = sshll.u32 %s252_s28, 4  ;;  %s1290_s20 = int_to_ptr.vmem [resolvable:$true] %s1289_s20 }
 0x1dd   : > { %1095 = vst.msk [vmem:[#allocation7] sm:$0xf] %vm1094_vm3, %v1083_v50  ;;  %s1291_s26 = sshll.u32 %s1288_s16, 4  ;;  %s1292_s26 = int_to_ptr.hbm [resolvable:$true] %s1291_s26 }
 0x1de   : > { %985 = vst.msk [vmem:[#allocation6 + $0x20] sm:$0xf] %vm904_vm12, %v976_v54  ;;  %s1537_s13 = sshra.s32 %s1292_s26, 4  ;;  %s1538_s13 = int_to_ptr.hbm [resolvable:$true] %s1537_s13 }
 0x1df   : > { %953 = vst.msk [vmem:[#allocation5 + $0x41] sm:$0xf] %vm904_vm12, %v944_v55  ;;  %s1539_s25 = scalar_lea.hbm %s1538_s13, 16  ;;  %p1544_p0 = scmp.lt.s32.totalorder %s1538_s13, %s2206_s6 }
 0x1e0   : > { %1120 = vst.msk [vmem:[#allocation7] sm:$0xf] %vm1119_vm4, %v1108_v36  ;;  %p1540_p11 = scmp.ne.s32.totalorder %s1538_s13, %s1539_s25  ;;  %p1545_p1 = scmp.lt.s32.totalorder %s1543_s12, %s1539_s25 }
 0x1e2   : > { %p1541_p12 = pnand %p1540_p11, %p1673_p5  ;;  %p1546_p2 = por %p1545_p1, %p1544_p0 }
 0x1e3   : > { %v2087_v56 = vpop.permute.xlu0 %1135 }
 0x1e4   : > { %v1035_v2 = vpop.permute.xlu2 %1034  ;;  %p1542_p13 = pneg %p1541_p12 }
 0x1e5   : > { %v1154_v57 = vld [vmem:[#allocation6 + $0x20] sm:$0xf] }
 0x1e6   : > { %1165 = vrot.lane.b32.xlu0 %v1154_v57, %s1598_s17  ;;  %v1179_v58 = vld [vmem:[#allocation5 + $0x41] sm:$0xf]  ;;  %p1547_p3 = pnand %p1546_p2, %p1542_p13 }
 0x1e7   : > { %v1128_v59 = vld [vmem:[#allocation5 + $0x40] sm:$0xf]  ;;  %1190 = vrot.lane.b32.xlu2 %v1179_v58, %s1599_s10 }
 0x1e8   : > { %1139 = vrot.lane.b32.xlu1 %v1128_v59, %s1597_s29 }
 0x1eb   : > { %v1012_v60 = vpop.permute.xlu0 %1011 }
 0x1ec   : > { %1022 = vst.msk [vmem:[#allocation7 + $0x10] sm:$0xf] %vm1019_vm0, %v1012_v60  ;;  %v1187_v7 = vpop.permute.xlu2 %1186 }
 0x1ee   : > { %1133 = vrot.lane.b32.xlu0 %v1125_v61, %s1597_s29 }
 0x1ef   : > { %1184 = vrot.lane.b32.xlu2 %v1176_v62, %s1599_s10 }
 0x1f0   : > { %1159 = vrot.lane.b32.xlu1 %v1151_v63, %s1598_s17 }
 0x1fb   : > { %v1010_v1 = vpop.permute.xlu1 %1009 }
 0x1fc   : > { %1021 = vst.msk [vmem:[#allocation7 + $0x8] sm:$0xf] %vm1019_vm0, %v1010_v1 }
 0x1fd   : > { %1046 = vst.msk [vmem:[#allocation7 + $0x8] sm:$0xf] %vm1044_vm1, %v1035_v2 }
 0x203   : > { %v1162_v3 = vpop.permute.xlu1 %1161 }
 0x20b   : > { %v1037_v8 = vpop.permute.xlu1 %1036 }
 0x20c   : > { %1047 = vst.msk [vmem:[#allocation7 + $0x10] sm:$0xf] %vm1044_vm1, %v1037_v8 }
 0x213   : > { %v1110_v13 = vpop.permute.xlu2 %1109 }
 0x21b   : > { %v1062_v18 = vpop.permute.xlu2 %1061 }
 0x21c   : > { %1072 = vst.msk [vmem:[#allocation7 + $0x10] sm:$0xf] %vm1069_vm2, %v1062_v18 }
 0x223   : > { %v1138_v19 = vpop.permute.xlu2 %1137 }
 0x22a   : > { %v1085_v20 = vpop.permute.xlu1 %1084 }
 0x22b   : > { %v1014_v21 = vpop.permute.xlu2 %1013 }
 0x22c   : > { %v1060_v22 = vpop.permute.xlu0 %1059  ;;  %1023 = vst.msk [vmem:[#allocation7 + $0x18] sm:$0xf] %vm1019_vm0, %v1014_v21 }
 0x22d   : > { %1071 = vst.msk [vmem:[#allocation7 + $0x8] sm:$0xf] %vm1069_vm2, %v1060_v22 }
 0x22e   : > { %1096 = vst.msk [vmem:[#allocation7 + $0x8] sm:$0xf] %vm1094_vm3, %v1085_v20 }
 0x22f   : > { %1121 = vst.msk [vmem:[#allocation7 + $0x8] sm:$0xf] %vm1119_vm4, %v1110_v13 }
 0x230   : > { %1147 = vst.msk [vmem:[#allocation7 + $0x8] sm:$0xf] %vm1145_vm6, %v2087_v56 }
 0x231   : > { %1173 = vst.msk [vmem:[#allocation7 + $0x8] sm:$0xf] %vm1171_vm7, %v1162_v3 }
 0x232   : > { %1198 = vst.msk [vmem:[#allocation7 + $0x8] sm:$0xf] %vm1196_vm8, %v1187_v7  ;;  %v1112_v0 = vpop.permute.xlu1 %1111 }
 0x233   : > { %v1089_v4 = vpop.permute.xlu2 %1088 }
 0x234   : > { %v1087_v23 = vpop.permute.xlu0 %1086 }
 0x235   : > { %1097 = vst.msk [vmem:[#allocation7 + $0x10] sm:$0xf] %vm1094_vm3, %v1087_v23 }
 0x236   : > { %1122 = vst.msk [vmem:[#allocation7 + $0x10] sm:$0xf] %vm1119_vm4, %v1112_v0 }
 0x237   : > { %1148 = vst.msk [vmem:[#allocation7 + $0x10] sm:$0xf] %vm1145_vm6, %v1138_v19 }
 0x239   : > { %v1202_v24 = vld [vmem:[#allocation7 + $0x8] sm:$0xff] }
 0x23a   : > { %1444 = vmatmul.msk.f32.vlgmr.msra.gmra.mxu3 %vm1214_vm9, %v1202_v24  ;;  %v1189_v25 = vpop.permute.xlu1 %1188 }
 0x23c   : > { %v1164_v26 = vpop.permute.xlu0 %1163 }
 0x23d   : > { %1174 = vst.msk [vmem:[#allocation7 + $0x10] sm:$0xf] %vm1171_vm7, %v1164_v26 }
 0x23e   : > { %1199 = vst.msk [vmem:[#allocation7 + $0x10] sm:$0xf] %vm1196_vm8, %v1189_v25 }
 0x241   : > { %v1191_v31 = vpop.permute.xlu2 %1190 }
 0x242   : > { %v1064_v27 = vpop.permute.xlu1 %1063 }
 0x244   : > { %v1039_v28 = vpop.permute.xlu0 %1038 }
 0x245   : > { %1048 = vst.msk [vmem:[#allocation7 + $0x18] sm:$0xf] %vm1044_vm1, %v1039_v28  ;;  %v1203_v29 = vld [vmem:[#allocation7 + $0x10] sm:$0xff] }
 0x246   : > { %1073 = vst.msk [vmem:[#allocation7 + $0x18] sm:$0xf] %vm1069_vm2, %v1064_v27  ;;  %1445 = vmatmul.msk.f32.gmra.mxu3 %vm1214_vm9, %v1203_v29 }
 0x247   : > { %1098 = vst.msk [vmem:[#allocation7 + $0x18] sm:$0xf] %vm1094_vm3, %v1089_v4 }
 0x249   : > { %v1185_v35 = vpop.permute.xlu2 %1184 }
 0x24c   : > { %v1114_v30 = vpop.permute.xlu0 %1113 }
 0x24d   : > { %1123 = vst.msk [vmem:[#allocation7 + $0x18] sm:$0xf] %vm1119_vm4, %v1114_v30 }
 0x258   : > { %v1166_v32 = vpop.permute.xlu0 %1165 }
 0x25a   : > { %v1140_v33 = vpop.permute.xlu1 %1139 }
 0x25b   : > { %1149 = vst.msk [vmem:[#allocation7 + $0x18] sm:$0xf] %vm1145_vm6, %v1140_v33 }
 0x25c   : > { %1175 = vst.msk [vmem:[#allocation7 + $0x18] sm:$0xf] %vm1171_vm7, %v1166_v32 }
 0x25d   : > { %1200 = vst.msk [vmem:[#allocation7 + $0x18] sm:$0xf] %vm1196_vm8, %v1191_v31 }
 0x260   : > { %v1134_v14 = vpop.permute.xlu0 %1133 }
 0x261   : > { %1146 = vst.msk [vmem:[#allocation7] sm:$0xf] %vm1145_vm6, %v1134_v14 }
 0x262   : > { %v1160_v34 = vpop.permute.xlu1 %1159 }
 0x263   : > { %1172 = vst.msk [vmem:[#allocation7] sm:$0xf] %vm1171_vm7, %v1160_v34 }
 0x264   : > { %1197 = vst.msk [vmem:[#allocation7] sm:$0xf] %vm1196_vm8, %v1185_v35  ;;  %v1204_v37 = vld [vmem:[#allocation7 + $0x18] sm:$0xff] }
 0x265   : > { %1446 = vmatmul.msk.f32.gmra.mxu3 %vm1214_vm9, %v1204_v37 }
 0x26b   : > { %v1201_v38 = vld [vmem:[#allocation7] sm:$0xff] }
 0x26c   : > { %1443 = vmatmul.msk.f32.vlgmr.msra.gmra.mxu1 %vm1214_vm9, %v1201_v38 }
 0x2bd   : > { %v1247_v40 = vpop.f32.mrf.mxu3 }
 0x2be   : > { %v1261_v41 = vadd.f32 %v1522_v39, %v1247_v40 }
 0x2c0   : > { %1265 = vst.msk [vmem:[%s252_s28 + $0x4] sm:$0xf] %vm904_vm12, %v1261_v41 }
 0x2c9   : > { %v1250_v42 = vpop.f32.mrf.mxu3 }
 0x2ca   : > { %v1262_v43 = vadd.f32 %v1522_v39, %v1250_v42 }
 0x2cc   : > { %1266 = vst.msk [vmem:[%s252_s28 + $0x8] sm:$0xf] %vm904_vm12, %v1262_v43 }
 0x2e8   : > { %v1253_v44 = vpop.f32.mrf.mxu3 }
 0x2e9   : > { %v1263_v45 = vadd.f32 %v1522_v39, %v1253_v44  ;;  %v1244_v46 = vpop.f32.mrf.mxu1 }
 0x2ea   : > { %v1260_v47 = vadd.f32 %v1522_v39, %v1244_v46 }
 0x2eb   : > { %1267 = vst.msk [vmem:[%s252_s28 + $0xc] sm:$0xf] %vm904_vm12, %v1263_v45 }
 0x2ec   : > { %1264 = vst.msk [vmem:[%s252_s28] sm:$0xf] %vm904_vm12, %v1260_v47 }
 0x2ed   : > { %1550 = shalt.err (!%p1547_p3)
}
 0x2ee   : > { %1469 = dma.vmem_to_hbm [thread:$0]  (%p1673_p5), %s1290_s20, 256, %s1292_s26, %s1274_s11, %s1599_s10, %s1599_s10, %s1588_s14  }
 0x2ef PF: > { %p1475_p4 = scmp.ge.s32.totalorder %s1585_s24, 2  ;;  %s1314_s15 = sand.u32 1, %s1573_s21  }
 0x2f0   : > { %s1315_s28 = scalar_lea.sflag [#allocation9], %s1314_s15 }
 0x2f1   : > { %p1472_p7 = pnand %p1475_p4, %p1677_p6 }
 0x2f3   : > { %p1473_p8 = pneg %p1472_p7 }
 0x2f5   : > { %1568 = dma.done.wait (%p1473_p8), %s1315_s28, 256  }
 0x2f6   : > { %1570 = vsyncadd (%p1473_p8), %s1315_s28, 4294967040  ;;  %p17_p9 = scmp.ge.s32.totalorder %s1660_s27, 4   ;;  %s2212_s21 = smov %s1577_s22 }
 0x2f7   : > { %s2213_s22 = smov %s1581_s23  ;;  %s2214_s23 = smov %s1671_s30 }
 0x2f8   : > { %s2215_s24 = smov %s1660_s27  ;;  %19 = sbr.rel (!%p17_p9) target bundleno = 3 (0x3), region = 145 }
 0x2fd   :  { %1321 = vsyncpa [#allocation9], 1 }
 0x2fe   :  { %1323 = vsyncpa [#allocation9 + $0x1], 1 }

</bundles_post_ra>
